<compile_context>
chip_gen: v6e
topology: v6e:2x2x1
jax: 0.10.0
libtpu: 0.0.40
codegen_flags: <defaults>
</compile_context>

<pallas_src>
import jax
import jax.numpy as jnp
from jax.experimental import pallas as pl
from jax.experimental.pallas import tpu as pltpu

K_IN = 784        # 28*28 (kept unpadded; equals full array dim -> legal block)
H1 = 256
H2 = 128
H3 = 64
H3_PAD = 128      # lane-dense hidden width
N_OUT = 10
N_OUT_PAD = 128   # lane-dense output width
BN_EPS = 1e-5
TB_MAX = 512      # max batch tile (512 amortizes per-step overhead; fits VMEM)


# ----------------------------------------------------------------------------
# Fused kernel: (x @ W' + shift -> ReLU) x3, then final Linear.
# BN (gamma, running stats) + Linear bias folded into (W', shift) at prep time.
# All matmul operands bf16, all accumulation f32.
# ----------------------------------------------------------------------------
def fcn_kernel(x_ref, w1_ref, t1_ref, w2_ref, t2_ref,
               w3_ref, t3_ref, w4_ref, b4_ref, o_ref):
    # in-kernel f32 -> bf16 cast (avoids a separate wrapper HBM pass over x)
    x = x_ref[...].astype(jnp.bfloat16)
    # layer 1: (tb, 784) @ (784, 256) -> +shift -> ReLU
    h = jnp.dot(x, w1_ref[...], preferred_element_type=jnp.float32)
    h = jnp.maximum(h + t1_ref[...], 0.0)
    # TODO(synk): Dropout is identity in eval mode; a training-mode mask would
    # use pltpu.prng_seed + pltpu.prng_random_bits here.
    # layer 2: (tb, 256) @ (256, 128) -> +shift -> ReLU
    h = jnp.dot(h.astype(jnp.bfloat16), w2_ref[...],
                preferred_element_type=jnp.float32)
    h = jnp.maximum(h + t2_ref[...], 0.0)
    # layer 3: (tb, 128) @ (128, 128[=64 padded]) -> +shift -> ReLU
    h = jnp.dot(h.astype(jnp.bfloat16), w3_ref[...],
                preferred_element_type=jnp.float32)
    h = jnp.maximum(h + t3_ref[...], 0.0)
    # layer 4: (tb, 128) @ (128, 128[=10 padded]) + bias, lane-dense store
    h = jnp.dot(h.astype(jnp.bfloat16), w4_ref[...],
                preferred_element_type=jnp.float32)
    o_ref[...] = (h + b4_ref[...]).astype(o_ref.dtype)


# ----------------------------------------------------------------------------
# Wrapper: flatten, adaptive batch tile, batch-tiled pallas_call, slice pad off.
# ----------------------------------------------------------------------------
def fully_connected_mnist_forward(x, kparams, *, tb_max=TB_MAX):
    (w1, t1, w2, t2, w3, t3, w4, b4) = kparams
    B = x.shape[0]
    x2d = jnp.reshape(x, (B, -1))                     # (B, 784), source dtype

    # Adaptive tile: big batches get the large tile, small batches don't pay
    # for up to tb-1 wasted rows.
    tb = int(min(tb_max, pl.cdiv(B, 128) * 128))
    bp = pl.cdiv(B, tb) * tb
    if bp != B:
        x2d = jnp.pad(x2d, ((0, bp - B), (0, 0)))     # tail rows sliced off

    def const_spec(shape):
        return pl.BlockSpec(shape, lambda i: (0, 0))  # VMEM-resident weights

    flops = 2 * bp * (K_IN * H1 + H1 * H2 + H2 * H3_PAD + H3_PAD * N_OUT_PAD)
    bytes_accessed = (
        bp * K_IN * x2d.dtype.itemsize          # x in
        + bp * N_OUT_PAD * 4                    # out
        + 2 * (K_IN * H1 + H1 * H2 + H2 * H3_PAD + H3_PAD * N_OUT_PAD)  # bf16 W
        + 4 * (H1 + H2 + H3_PAD + N_OUT_PAD))   # f32 shifts/bias

    out = pl.pallas_call(
        fcn_kernel,
        out_shape=jax.ShapeDtypeStruct((bp, N_OUT_PAD), jnp.float32),
        grid=(bp // tb,),
        in_specs=[
            pl.BlockSpec((tb, K_IN), lambda i: (i, 0)),        # x tile
            const_spec((K_IN, H1)), const_spec((1, H1)),
            const_spec((H1, H2)), const_spec((1, H2)),
            const_spec((H2, H3_PAD)), const_spec((1, H3_PAD)),
            const_spec((H3_PAD, N_OUT_PAD)), const_spec((1, N_OUT_PAD)),
        ],
        out_specs=pl.BlockSpec((tb, N_OUT_PAD), lambda i: (i, 0)),
        compiler_params=pltpu.CompilerParams(
            dimension_semantics=("parallel",)),
        cost_estimate=pl.CostEstimate(
            flops=flops, transcendentals=0, bytes_accessed=bytes_accessed),
    )(x2d, w1, t1, w2, t2, w3, t3, w4, b4)
    return out[:B, :N_OUT]


# ----------------------------------------------------------------------------
# "PyTorch-side" parameters (f32, unpadded) and folding/padding for the kernel.
# ----------------------------------------------------------------------------
def init_torch_params(key):
    ks = jax.random.split(key, 20)

    def linear(kw, kb, fan_in, fan_out):
        bound = 1.0 / jnp.sqrt(float(fan_in))
        w = jax.random.uniform(kw, (fan_in, fan_out), jnp.float32, -bound, bound)
        b = jax.random.uniform(kb, (fan_out,), jnp.float32, -bound, bound)
        return w, b

    def bn_stats(kg, kb, km, kv, n):
        gamma = 1.0 + 0.1 * jax.random.normal(kg, (n,), jnp.float32)
        beta = 0.1 * jax.random.normal(kb, (n,), jnp.float32)
        mean = 0.1 * jax.random.normal(km, (n,), jnp.float32)
        var = 1.0 + 0.1 * jax.random.uniform(kv, (n,), jnp.float32)
        return gamma, beta, mean, var

    w1, b1 = linear(ks[0], ks[1], K_IN, H1)
    bn1 = bn_stats(ks[2], ks[3], ks[4], ks[5], H1)
    w2, b2 = linear(ks[6], ks[7], H1, H2)
    bn2 = bn_stats(ks[8], ks[9], ks[10], ks[11], H2)
    w3, b3 = linear(ks[12], ks[13], H2, H3)
    bn3 = bn_stats(ks[14], ks[15], ks[16], ks[17], H3)
    w4, b4 = linear(ks[18], ks[19], H3, N_OUT)
    return (w1, b1, bn1, w2, b2, bn2, w3, b3, bn3, w4, b4)


def prepare_kernel_params(tp):
    (w1, b1, bn1, w2, b2, bn2, w3, b3, bn3, w4, b4) = tp

    def fold(w, b, bn, n_pad=None):
        # BN(running stats) + Linear bias folded into (W*scale, shift):
        #   y = scale * (x@W + b - mean) + beta = x @ (W*scale) + shift
        gamma, beta, mean, var = bn
        scale = gamma / jnp.sqrt(var + BN_EPS)
        wf = w * scale[None, :]
        shift = b * scale + beta - mean * scale
        if n_pad is not None:
            pn = n_pad - wf.shape[1]
            wf = jnp.pad(wf, ((0, 0), (0, pn)))       # padded cols -> 0
            shift = jnp.pad(shift, (0, pn))           # padded shift -> 0
        return (wf.astype(jnp.bfloat16),
                shift.reshape(1, -1).astype(jnp.float32))

    kw1, t1 = fold(w1, b1, bn1)
    kw2, t2 = fold(w2, b2, bn2)
    kw3, t3 = fold(w3, b3, bn3, n_pad=H3_PAD)
    kw4 = jnp.pad(w4, ((0, H3_PAD - H3), (0, N_OUT_PAD - N_OUT))
                  ).astype(jnp.bfloat16)
    kb4 = jnp.pad(b4, (0, N_OUT_PAD - N_OUT)).reshape(1, -1).astype(jnp.float32)
    return (kw1, t1, kw2, t2, kw3, t3, kw4, kb4)


# ----------------------------------------------------------------------------
# Pure-JAX eval-mode reference (f32, mirrors the PyTorch module exactly).
# ----------------------------------------------------------------------------
def reference_forward(x, tp):
    (w1, b1, bn1, w2, b2, bn2, w3, b3, bn3, w4, b4) = tp

    def bn(h, stats):
        gamma, beta, mean, var = stats
        return gamma * (h - mean) / jnp.sqrt(var + BN_EPS) + beta

    h = jnp.reshape(x, (x.shape[0], -1))
    h = jnp.maximum(bn(h @ w1 + b1, bn1), 0.0)   # dropout = identity (eval)
    h = jnp.maximum(bn(h @ w2 + b2, bn2), 0.0)
    h = jnp.maximum(bn(h @ w3 + b3, bn3), 0.0)
    return h @ w4 + b4


if __name__ == "__main__":
    key = jax.random.PRNGKey(0)
    kx, kp = jax.random.split(key)

    B = 256  # small; adaptive tile picks tb=256, single lane-dense grid step
    x = jax.random.normal(kx, (B, 1, 28, 28), jnp.float32)  # MNIST-like NCHW
    torch_params = init_torch_params(kp)
    kernel_params = prepare_kernel_params(torch_params)

    fwd = jax.jit(fully_connected_mnist_forward)
    out = jax.block_until_ready(fwd(x, kernel_params))

    ref = reference_forward(x, torch_params)
    assert out.shape == (B, N_OUT)
    # bf16 weights/activations vs. f32 reference -> loose tolerance.
    assert jnp.allclose(out, ref, atol=5e-2, rtol=5e-2)

    print("KERNEL_OK")
</pallas_src>

<mosaic_0001>
module attributes {stable_mosaic.version = 11 : i64} {
  func.func @fcn_kernel(%arg0: i32, %arg1: memref<256x784xf32, #tpu.memory_space<vmem>>, %arg2: memref<784x256xbf16, #tpu.memory_space<vmem>>, %arg3: memref<1x256xf32, #tpu.memory_space<vmem>>, %arg4: memref<256x128xbf16, #tpu.memory_space<vmem>>, %arg5: memref<1x128xf32, #tpu.memory_space<vmem>>, %arg6: memref<128x128xbf16, #tpu.memory_space<vmem>>, %arg7: memref<1x128xf32, #tpu.memory_space<vmem>>, %arg8: memref<128x128xbf16, #tpu.memory_space<vmem>>, %arg9: memref<1x128xf32, #tpu.memory_space<vmem>>, %arg10: memref<256x128xf32, #tpu.memory_space<vmem>>) attributes {dimension_semantics = [#tpu.dimension_semantics<parallel>], iteration_bounds = array<i64: 1>, scalar_prefetch = 0 : i64, scratch_operands = 0 : i64, tpu.core_type = #tpu.core_type<tc>, window_params = [{transform_indices = @transform_0, window_bounds = array<i64: 256, 784>}, {pipeline_mode = #tpu.pipeline_mode<synchronous>, transform_indices = @transform_1, window_bounds = array<i64: 784, 256>}, {pipeline_mode = #tpu.pipeline_mode<synchronous>, transform_indices = @transform_2, window_bounds = array<i64: 1, 256>}, {pipeline_mode = #tpu.pipeline_mode<synchronous>, transform_indices = @transform_3, window_bounds = array<i64: 256, 128>}, {pipeline_mode = #tpu.pipeline_mode<synchronous>, transform_indices = @transform_4, window_bounds = array<i64: 1, 128>}, {pipeline_mode = #tpu.pipeline_mode<synchronous>, transform_indices = @transform_5, window_bounds = array<i64: 128, 128>}, {pipeline_mode = #tpu.pipeline_mode<synchronous>, transform_indices = @transform_6, window_bounds = array<i64: 1, 128>}, {pipeline_mode = #tpu.pipeline_mode<synchronous>, transform_indices = @transform_7, window_bounds = array<i64: 128, 128>}, {pipeline_mode = #tpu.pipeline_mode<synchronous>, transform_indices = @transform_8, window_bounds = array<i64: 1, 128>}, {transform_indices = @transform_9, window_bounds = array<i64: 256, 128>}]} {
    %c0 = arith.constant 0 : index
    %c0_0 = arith.constant 0 : index
    %0 = vector.load %arg1[%c0, %c0_0] : memref<256x784xf32, #tpu.memory_space<vmem>>, vector<256x784xf32>
    %1 = arith.truncf %0 : vector<256x784xf32> to vector<256x784xbf16>
    %c0_1 = arith.constant 0 : index
    %c0_2 = arith.constant 0 : index
    %2 = vector.load %arg2[%c0_1, %c0_2] : memref<784x256xbf16, #tpu.memory_space<vmem>>, vector<784x256xbf16>
    %cst = arith.constant dense<0.000000e+00> : vector<256x256xf32>
    %3 = tpu.matmul %1, %2, %cst {dimension_numbers = #tpu.dot_dimension_numbers<[1], [0], [0], [1], [0, 0, 1, 1], [], []>} : vector<256x784xbf16>, vector<784x256xbf16>, vector<256x256xf32> -> vector<256x256xf32>
    %c0_3 = arith.constant 0 : index
    %c0_4 = arith.constant 0 : index
    %4 = vector.load %arg3[%c0_3, %c0_4] : memref<1x256xf32, #tpu.memory_space<vmem>>, vector<1x256xf32>
    %5 = vector.broadcast %4 : vector<1x256xf32> to vector<256x256xf32>
    %6 = arith.addf %3, %5 : vector<256x256xf32>
    %cst_5 = arith.constant 0.000000e+00 : f32
    %7 = vector.broadcast %cst_5 : f32 to vector<256x256xf32>
    %8 = arith.maximumf %6, %7 : vector<256x256xf32>
    %9 = arith.truncf %8 : vector<256x256xf32> to vector<256x256xbf16>
    %c0_6 = arith.constant 0 : index
    %c0_7 = arith.constant 0 : index
    %10 = vector.load %arg4[%c0_6, %c0_7] : memref<256x128xbf16, #tpu.memory_space<vmem>>, vector<256x128xbf16>
    %cst_8 = arith.constant dense<0.000000e+00> : vector<256x128xf32>
    %11 = tpu.matmul %9, %10, %cst_8 {dimension_numbers = #tpu.dot_dimension_numbers<[1], [0], [0], [1], [0, 0, 1, 1], [], []>} : vector<256x256xbf16>, vector<256x128xbf16>, vector<256x128xf32> -> vector<256x128xf32>
    %c0_9 = arith.constant 0 : index
    %c0_10 = arith.constant 0 : index
    %12 = vector.load %arg5[%c0_9, %c0_10] : memref<1x128xf32, #tpu.memory_space<vmem>>, vector<1x128xf32>
    %13 = vector.broadcast %12 : vector<1x128xf32> to vector<256x128xf32>
    %14 = arith.addf %11, %13 : vector<256x128xf32>
    %cst_11 = arith.constant 0.000000e+00 : f32
    %15 = vector.broadcast %cst_11 : f32 to vector<256x128xf32>
    %16 = arith.maximumf %14, %15 : vector<256x128xf32>
    %17 = arith.truncf %16 : vector<256x128xf32> to vector<256x128xbf16>
    %c0_12 = arith.constant 0 : index
    %c0_13 = arith.constant 0 : index
    %18 = vector.load %arg6[%c0_12, %c0_13] : memref<128x128xbf16, #tpu.memory_space<vmem>>, vector<128x128xbf16>
    %cst_14 = arith.constant dense<0.000000e+00> : vector<256x128xf32>
    %19 = tpu.matmul %17, %18, %cst_14 {dimension_numbers = #tpu.dot_dimension_numbers<[1], [0], [0], [1], [0, 0, 1, 1], [], []>} : vector<256x128xbf16>, vector<128x128xbf16>, vector<256x128xf32> -> vector<256x128xf32>
    %c0_15 = arith.constant 0 : index
    %c0_16 = arith.constant 0 : index
    %20 = vector.load %arg7[%c0_15, %c0_16] : memref<1x128xf32, #tpu.memory_space<vmem>>, vector<1x128xf32>
    %21 = vector.broadcast %20 : vector<1x128xf32> to vector<256x128xf32>
    %22 = arith.addf %19, %21 : vector<256x128xf32>
    %cst_17 = arith.constant 0.000000e+00 : f32
    %23 = vector.broadcast %cst_17 : f32 to vector<256x128xf32>
    %24 = arith.maximumf %22, %23 : vector<256x128xf32>
    %25 = arith.truncf %24 : vector<256x128xf32> to vector<256x128xbf16>
    %c0_18 = arith.constant 0 : index
    %c0_19 = arith.constant 0 : index
    %26 = vector.load %arg8[%c0_18, %c0_19] : memref<128x128xbf16, #tpu.memory_space<vmem>>, vector<128x128xbf16>
    %cst_20 = arith.constant dense<0.000000e+00> : vector<256x128xf32>
    %27 = tpu.matmul %25, %26, %cst_20 {dimension_numbers = #tpu.dot_dimension_numbers<[1], [0], [0], [1], [0, 0, 1, 1], [], []>} : vector<256x128xbf16>, vector<128x128xbf16>, vector<256x128xf32> -> vector<256x128xf32>
    %c0_21 = arith.constant 0 : index
    %c0_22 = arith.constant 0 : index
    %28 = vector.load %arg9[%c0_21, %c0_22] : memref<1x128xf32, #tpu.memory_space<vmem>>, vector<1x128xf32>
    %29 = vector.broadcast %28 : vector<1x128xf32> to vector<256x128xf32>
    %30 = arith.addf %27, %29 : vector<256x128xf32>
    %c0_23 = arith.constant 0 : index
    %c0_24 = arith.constant 0 : index
    %31 = vector.load %arg10[%c0_23, %c0_24] : memref<256x128xf32, #tpu.memory_space<vmem>>, vector<256x128xf32>
    tpu.vector_store %arg10[%c0_23, %c0_24], %30 {strides = array<i32>} : memref<256x128xf32, #tpu.memory_space<vmem>>, vector<256x128xf32>,
    return
  }
  func.func @transform_0(%arg0: i32) -> (i32, i32) {
    %c0_i32 = arith.constant 0 : i32
    %c0_i32_0 = arith.constant 0 : i32
    return %arg0, %c0_i32 : i32, i32
  }
  func.func @transform_1(%arg0: i32) -> (i32, i32) {
    %c0_i32 = arith.constant 0 : i32
    %c0_i32_0 = arith.constant 0 : i32
    %c0_i32_1 = arith.constant 0 : i32
    return %c0_i32, %c0_i32_0 : i32, i32
  }
  func.func @transform_2(%arg0: i32) -> (i32, i32) {
    %c0_i32 = arith.constant 0 : i32
    %c0_i32_0 = arith.constant 0 : i32
    %c0_i32_1 = arith.constant 0 : i32
    return %c0_i32, %c0_i32_0 : i32, i32
  }
  func.func @transform_3(%arg0: i32) -> (i32, i32) {
    %c0_i32 = arith.constant 0 : i32
    %c0_i32_0 = arith.constant 0 : i32
    %c0_i32_1 = arith.constant 0 : i32
    return %c0_i32, %c0_i32_0 : i32, i32
  }
  func.func @transform_4(%arg0: i32) -> (i32, i32) {
    %c0_i32 = arith.constant 0 : i32
    %c0_i32_0 = arith.constant 0 : i32
    %c0_i32_1 = arith.constant 0 : i32
    return %c0_i32, %c0_i32_0 : i32, i32
  }
  func.func @transform_5(%arg0: i32) -> (i32, i32) {
    %c0_i32 = arith.constant 0 : i32
    %c0_i32_0 = arith.constant 0 : i32
    %c0_i32_1 = arith.constant 0 : i32
    return %c0_i32, %c0_i32_0 : i32, i32
  }
  func.func @transform_6(%arg0: i32) -> (i32, i32) {
    %c0_i32 = arith.constant 0 : i32
    %c0_i32_0 = arith.constant 0 : i32
    %c0_i32_1 = arith.constant 0 : i32
    return %c0_i32, %c0_i32_0 : i32, i32
  }
  func.func @transform_7(%arg0: i32) -> (i32, i32) {
    %c0_i32 = arith.constant 0 : i32
    %c0_i32_0 = arith.constant 0 : i32
    %c0_i32_1 = arith.constant 0 : i32
    return %c0_i32, %c0_i32_0 : i32, i32
  }
  func.func @transform_8(%arg0: i32) -> (i32, i32) {
    %c0_i32 = arith.constant 0 : i32
    %c0_i32_0 = arith.constant 0 : i32
    %c0_i32_1 = arith.constant 0 : i32
    return %c0_i32, %c0_i32_0 : i32, i32
  }
  func.func @transform_9(%arg0: i32) -> (i32, i32) {
    %c0_i32 = arith.constant 0 : i32
    %c0_i32_0 = arith.constant 0 : i32
    return %arg0, %c0_i32 : i32, i32
  }
}

</mosaic_0001>

<bundles_post_ra>
// kernel: fully_connected_mnist_forward.1
= control target key start
LH: loop header
LB: loop body
LE: loop exit
PB: predicated region body
PF: predicated region fallthrough
CT: control target
= control target key end

     0   :  { %vm969_vm0 = vcmask 130048   ;;  %s5014_s1 = inlined_call_operand.vmem [shape: bf16[784,256], index: 1, kind: input, shape index: {}]   ;;  %s5015_s0 = inlined_call_operand.vmem [shape: f32[256,784], index: 0, kind: input, shape index: {}]   ;;  %s5016_s3 = inlined_call_operand.vmem [shape: bf16[256,128], index: 3, kind: input, shape index: {}]   ;;  %s5017_s2 = inlined_call_operand.vmem [shape: f32[1,256], index: 2, kind: input, shape index: {}]   ;;  %s5018_s5 = inlined_call_operand.vmem [shape: bf16[128,128], index: 5, kind: input, shape index: {}]   ;;  %s5019_s4 = inlined_call_operand.vmem [shape: f32[1,128], index: 4, kind: input, shape index: {}]   ;;  %s5020_s7 = inlined_call_operand.vmem [shape: bf16[128,128], index: 7, kind: input, shape index: {}]   ;;  %s5021_s6 = inlined_call_operand.vmem [shape: f32[1,128], index: 6, kind: input, shape index: {}]   ;;  %s5022_s8 = inlined_call_operand.vmem [shape: f32[1,128], index: 8, kind: input, shape index: {}]   ;;  %s5023_s9 = inlined_call_operand.vmem [shape: f32[256,128], index: 9, kind: output, shape index: {}]  }
   0x1   :  { %v3184_v0 = vld [vmem:[%s5014_s1 + $0x74] ss:$8 sps:$4 sm:$0xff]   ;;  %v3188_v2 = vld [vmem:[%s5014_s1 + $0x70] ss:$8 sps:$4 sm:$0xff]   ;;  %v3190_v4 = vld [vmem:[%s5014_s1 + $0x64] ss:$8 sps:$4 sm:$0xff]  }
   0x2   :  { %v3186_v1 = vld [vmem:[%s5014_s1 + $0x174] ss:$8 sps:$4 sm:$0xff]   ;;  %1018 = vmatprep.subr.bf16.mxu0 %v3184_v0  ;;  %v3189_v3 = vld [vmem:[%s5014_s1 + $0x170] ss:$8 sps:$4 sm:$0xff]   ;;  %v3192_v5 = vld [vmem:[%s5014_s1 + $0x164] ss:$8 sps:$4 sm:$0xff]  }
   0x3   :  { %1211 = vmatprep.subr.bf16.mxu1 %v3186_v1  ;;  %1019 = vmatpush1.bf16.msra.mxu0 %v3188_v2  ;;  %v3194_v6 = vld [vmem:[%s5014_s1 + $0x60] ss:$8 sps:$4 sm:$0xff]   ;;  %v3196_v8 = vld [vmem:[%s5014_s1 + $0x54] ss:$8 sps:$4 sm:$0xff]   ;;  %v3200_v10 = vld [vmem:[%s5014_s1 + $0x50] ss:$8 sps:$4 sm:$0xff]  }
   0x4   :  { %1212 = vmatpush1.bf16.msra.mxu1 %v3189_v3  ;;  %1020 = vmatprep.subr.bf16.mxu0 %v3190_v4  ;;  %v3195_v7 = vld [vmem:[%s5014_s1 + $0x160] ss:$8 sps:$4 sm:$0xff]   ;;  %v3198_v9 = vld [vmem:[%s5014_s1 + $0x154] ss:$8 sps:$4 sm:$0xff]   ;;  %v3201_v11 = vld [vmem:[%s5014_s1 + $0x150] ss:$8 sps:$4 sm:$0xff]  }
   0x5   :  { %1213 = vmatprep.subr.bf16.mxu1 %v3192_v5  ;;  %v3202_v12 = vld [vmem:[%s5014_s1 + $0x44] ss:$8 sps:$4 sm:$0xff]   ;;  %v3206_v14 = vld [vmem:[%s5014_s1 + $0x40] ss:$8 sps:$4 sm:$0xff]   ;;  %v3208_v16 = vld [vmem:[%s5014_s1 + $0x34] ss:$8 sps:$4 sm:$0xff]  }
   0x6   :  { %v3204_v13 = vld [vmem:[%s5014_s1 + $0x144] ss:$8 sps:$4 sm:$0xff]   ;;  %v3207_v15 = vld [vmem:[%s5014_s1 + $0x140] ss:$8 sps:$4 sm:$0xff]   ;;  %v3210_v17 = vld [vmem:[%s5014_s1 + $0x134] ss:$8 sps:$4 sm:$0xff]  }
   0x7   :  { %1021 = vmatpush1.bf16.msra.mxu0 %v3194_v6  ;;  %v3212_v18 = vld [vmem:[%s5014_s1 + $0x30] ss:$8 sps:$4 sm:$0xff]   ;;  %v3214_v20 = vld [vmem:[%s5014_s1 + $0x24] ss:$8 sps:$4 sm:$0xff]   ;;  %v3218_v22 = vld [vmem:[%s5014_s1 + $0x20] ss:$8 sps:$4 sm:$0xff]  }
   0x8   :  { %1214 = vmatpush1.bf16.msra.mxu1 %v3195_v7  ;;  %1022 = vmatprep.subr.bf16.mxu0 %v3196_v8  ;;  %v3213_v19 = vld [vmem:[%s5014_s1 + $0x130] ss:$8 sps:$4 sm:$0xff]   ;;  %v3216_v21 = vld [vmem:[%s5014_s1 + $0x124] ss:$8 sps:$4 sm:$0xff]   ;;  %v3219_v23 = vld [vmem:[%s5014_s1 + $0x120] ss:$8 sps:$4 sm:$0xff]  }
   0x9   :  { %1215 = vmatprep.subr.bf16.mxu1 %v3198_v9  ;;  %v3220_v24 = vld [vmem:[%s5014_s1 + $0x14] ss:$8 sps:$4 sm:$0xff]   ;;  %v3224_v26 = vld [vmem:[%s5014_s1 + $0x10] ss:$8 sps:$4 sm:$0xff]   ;;  %v3226_v28 = vld [vmem:[%s5014_s1 + $0x4] ss:$8 sps:$4 sm:$0xff]  }
   0xa   :  { %v3222_v25 = vld [vmem:[%s5014_s1 + $0x114] ss:$8 sps:$4 sm:$0xff]   ;;  %v3225_v27 = vld [vmem:[%s5014_s1 + $0x110] ss:$8 sps:$4 sm:$0xff]   ;;  %v3228_v29 = vld [vmem:[%s5014_s1 + $0x104] ss:$8 sps:$4 sm:$0xff]  }
   0xb   :  { %1023 = vmatpush1.bf16.msra.mxu0 %v3200_v10  ;;  %v3230_v30 = vld [vmem:[%s5014_s1] ss:$8 sps:$4 sm:$0xff]   ;;  %v3232_v32 = vld [vmem:[%s5014_s1 + $0xf4] ss:$8 sps:$4 sm:$0xff]   ;;  %v3236_v34 = vld [vmem:[%s5014_s1 + $0xf0] ss:$8 sps:$4 sm:$0xff]  }
   0xc   :  { %1216 = vmatpush1.bf16.msra.mxu1 %v3201_v11  ;;  %1024 = vmatprep.subr.bf16.mxu0 %v3202_v12  ;;  %v3231_v31 = vld [vmem:[%s5014_s1 + $0x100] ss:$8 sps:$4 sm:$0xff]   ;;  %v3234_v33 = vld [vmem:[%s5014_s1 + $0x1f4] ss:$8 sps:$4 sm:$0xff]   ;;  %v3237_v35 = vld [vmem:[%s5014_s1 + $0x1f0] ss:$8 sps:$4 sm:$0xff]  }
   0xd   :  { %1217 = vmatprep.subr.bf16.mxu1 %v3204_v13  ;;  %v3238_v36 = vld [vmem:[%s5014_s1 + $0xe4] ss:$8 sps:$4 sm:$0xff]   ;;  %v3242_v38 = vld [vmem:[%s5014_s1 + $0xe0] ss:$8 sps:$4 sm:$0xff]   ;;  %v3244_v40 = vld [vmem:[%s5014_s1 + $0xd4] ss:$8 sps:$4 sm:$0xff]  }
   0xe   :  { %v3240_v37 = vld [vmem:[%s5014_s1 + $0x1e4] ss:$8 sps:$4 sm:$0xff]   ;;  %v3243_v39 = vld [vmem:[%s5014_s1 + $0x1e0] ss:$8 sps:$4 sm:$0xff]   ;;  %v3246_v41 = vld [vmem:[%s5014_s1 + $0x1d4] ss:$8 sps:$4 sm:$0xff]  }
   0xf   :  { %1025 = vmatpush1.bf16.msra.mxu0 %v3206_v14  ;;  %v3248_v42 = vld [vmem:[%s5014_s1 + $0xd0] ss:$8 sps:$4 sm:$0xff]   ;;  %v3250_v44 = vld [vmem:[%s5014_s1 + $0xc4] ss:$8 sps:$4 sm:$0xff]   ;;  %v3254_v50 = vld [vmem:[%s5014_s1 + $0xc0] ss:$8 sps:$4 sm:$0xff]  }
  0x10   :  { %1218 = vmatpush1.bf16.msra.mxu1 %v3207_v15  ;;  %1026 = vmatprep.subr.bf16.mxu0 %v3208_v16  ;;  %v3249_v43 = vld [vmem:[%s5014_s1 + $0x1d0] ss:$8 sps:$4 sm:$0xff]   ;;  %v3252_v45 = vld [vmem:[%s5014_s1 + $0x1c4] ss:$8 sps:$4 sm:$0xff]   ;;  %v3255_v51 = vld [vmem:[%s5014_s1 + $0x1c0] ss:$8 sps:$4 sm:$0xff]  }
  0x11   :  { %1219 = vmatprep.subr.bf16.mxu1 %v3210_v17  ;;  %v34_v46 = vld [vmem:[%s5015_s0 + $0x8] sm:$0xff]  ;;  %v41_v47 = vld [vmem:[%s5015_s0 + $0x40] sm:$0xff]  ;;  %v36_v48 = vld [vmem:[%s5015_s0 + $0x18] sm:$0xff] }
  0x12   :  { %v43_v49 = vld [vmem:[%s5015_s0 + $0x50] sm:$0xff]  ;;  %v258_v53 = vpack.c.bf16 %v41_v47, %v34_v46  ;;  %v3262_v58 = vld [vmem:[%s5014_s1 + $0xa4] ss:$8 sps:$4 sm:$0xff]   ;;  %v3266_v60 = vld [vmem:[%s5014_s1 + $0xa0] ss:$8 sps:$4 sm:$0xff]  }
  0x13   :  { %1027 = vmatpush1.bf16.msra.mxu0 %v3212_v18  ;;  %v3256_v52 = vld [vmem:[%s5014_s1 + $0xb4] ss:$8 sps:$4 sm:$0xff]   ;;  %v260_v54 = vpack.c.bf16 %v43_v49, %v36_v48  ;;  %v3260_v56 = vld [vmem:[%s5014_s1 + $0xb0] ss:$8 sps:$4 sm:$0xff]   ;;  %v3264_v59 = vld [vmem:[%s5014_s1 + $0x1a4] ss:$8 sps:$4 sm:$0xff]  }
  0x14   :  { %1220 = vmatpush1.bf16.msra.mxu1 %v3213_v19  ;;  %1028 = vmatprep.subr.bf16.mxu0 %v3214_v20  ;;  %v3258_v55 = vld [vmem:[%s5014_s1 + $0x1b4] ss:$8 sps:$4 sm:$0xff]   ;;  %v3261_v57 = vld [vmem:[%s5014_s1 + $0x1b0] ss:$8 sps:$4 sm:$0xff]   ;;  %v3267_v61 = vld [vmem:[%s5014_s1 + $0x1a0] ss:$8 sps:$4 sm:$0xff]  }
  0x15   :  { %1221 = vmatprep.subr.bf16.mxu1 %v3216_v21  ;;  %1050 = vmatprep.mubr.bf16.mxu0 %v258_v53  ;;  %v3268_v62 = vld [vmem:[%s5014_s1 + $0x94] ss:$8 sps:$4 sm:$0xff]   ;;  %v3272_v0 = vld [vmem:[%s5014_s1 + $0x90] ss:$8 sps:$4 sm:$0xff]   ;;  %v3274_v2 = vld [vmem:[%s5014_s1 + $0x84] ss:$8 sps:$4 sm:$0xff]  }
  0x16   :  { %1243 = vmatprep.mubr.bf16.mxu1 %v260_v54  ;;  %v3270_v63 = vld [vmem:[%s5014_s1 + $0x194] ss:$8 sps:$4 sm:$0xff]   ;;  %v3273_v1 = vld [vmem:[%s5014_s1 + $0x190] ss:$8 sps:$4 sm:$0xff]   ;;  %v3276_v3 = vld [vmem:[%s5014_s1 + $0x184] ss:$8 sps:$4 sm:$0xff]  }
  0x17   :  { %1029 = vmatpush1.bf16.msra.mxu0 %v3218_v22  ;;  %v3278_v4 = vld [vmem:[%s5014_s1 + $0x80] ss:$8 sps:$4 sm:$0xff]   ;;  %v40_v7 = vld [vmem:[%s5015_s0 + $0x38] sm:$0xff]  ;;  %v35_v8 = vld [vmem:[%s5015_s0 + $0x10] sm:$0xff] }
  0x18   :  { %1222 = vmatpush1.bf16.msra.mxu1 %v3219_v23  ;;  %1030 = vmatprep.subr.bf16.mxu0 %v3220_v24  ;;  %v3279_v5 = vld [vmem:[%s5014_s1 + $0x180] ss:$8 sps:$4 sm:$0xff]   ;;  %v3282_v10 = vld [vmem:[%s5014_s1 + $0x274] ss:$8 sps:$4 sm:$0xff]   ;;  %v3285_v11 = vld [vmem:[%s5014_s1 + $0x304] ss:$8 sps:$4 sm:$0xff]  }
  0x19   :  { %1223 = vmatprep.subr.bf16.mxu1 %v3222_v25  ;;  %v33_v6 = vld [vmem:[%s5015_s0] sm:$0xff]  ;;  %v42_v9 = vld [vmem:[%s5015_s0 + $0x48] sm:$0xff]  ;;  %v48_v12 = vld [vmem:[%s5015_s0 + $0x78] sm:$0xff] }
  0x1a   :  { %v55_v13 = vld [vmem:[%s5015_s0 + $0xb0] sm:$0xff]  ;;  %v50_v14 = vld [vmem:[%s5015_s0 + $0x88] sm:$0xff]  ;;  %v57_v15 = vld [vmem:[%s5015_s0 + $0xc0] sm:$0xff]  ;;  %v257_v16 = vpack.c.bf16 %v40_v7, %v33_v6  ;;  %v259_v17 = vpack.c.bf16 %v42_v9, %v35_v8 }
  0x1b   :  { %1031 = vmatpush1.bf16.msra.mxu0 %v3224_v26  ;;  %v3280_v18 = vld [vmem:[%s5014_s1 + $0x270] ss:$8 sps:$4 sm:$0xff]   ;;  %v3283_v19 = vld [vmem:[%s5014_s1 + $0x300] ss:$8 sps:$4 sm:$0xff]   ;;  %v265_v20 = vpack.c.bf16 %v55_v13, %v48_v12  ;;  %v267_v21 = vpack.c.bf16 %v57_v15, %v50_v14  ;;  %v3288_v24 = vld [vmem:[%s5014_s1 + $0x264] ss:$8 sps:$4 sm:$0xff]  }
  0x1c   :  { %1224 = vmatpush1.bf16.msra.mxu1 %v3225_v27  ;;  %1032 = vmatprep.subr.bf16.mxu0 %v3226_v28  ;;  %v47_v22 = vld [vmem:[%s5015_s0 + $0x70] sm:$0xff]  ;;  %v54_v23 = vld [vmem:[%s5015_s0 + $0xa8] sm:$0xff]  ;;  %v49_v25 = vld [vmem:[%s5015_s0 + $0x80] sm:$0xff] }
  0x1d   :  { %1225 = vmatprep.subr.bf16.mxu1 %v3228_v29  ;;  %v56_v26 = vld [vmem:[%s5015_s0 + $0xb8] sm:$0xff]  ;;  %v3286_v27 = vld [vmem:[%s5014_s1 + $0x260] ss:$8 sps:$4 sm:$0xff]   ;;  %v75_v54 = vld [vmem:[%s5015_s0 + $0x150] sm:$0xff] }
  0x1e   :  { %v62_v28 = vld [vmem:[%s5015_s0 + $0xe8] sm:$0xff]  ;;  %v69_v29 = vld [vmem:[%s5015_s0 + $0x120] sm:$0xff]  ;;  %v3297_v48 = vld [vmem:[%s5014_s1 + $0x234] ss:$8 sps:$4 sm:$0xff]  }
  0x1f   :  { %1033 = vmatpush1.bf16.msra.mxu0 %v3230_v30  ;;  %v64_v30 = vld [vmem:[%s5015_s0 + $0xf8] sm:$0xff]  ;;  %v85_v46 = vld [vmem:[%s5015_s0 + $0x1a0] sm:$0xff]  ;;  %v91_v9 = vld [vmem:[%s5015_s0 + $0x1d0] sm:$0xff] }
  0x20   :  { %1226 = vmatpush1.bf16.msra.mxu1 %v3231_v31  ;;  %1034 = vmatprep.subr.bf16.mxu0 %v3232_v32  ;;  %v71_v31 = vld [vmem:[%s5015_s0 + $0x130] sm:$0xff]  ;;  %v3292_v47 = vld [vmem:[%s5014_s1 + $0x240] ss:$8 sps:$4 sm:$0xff]   ;;  %v3306_v7 = vld [vmem:[%s5014_s1 + $0x204] ss:$8 sps:$4 sm:$0xff]  }
  0x21   :  { %1227 = vmatprep.subr.bf16.mxu1 %v3234_v33  ;;  %v3291_v32 = vld [vmem:[%s5014_s1 + $0x254] ss:$8 sps:$4 sm:$0xff]   ;;  %v264_v33 = vpack.c.bf16 %v54_v23, %v47_v22  ;;  %v3295_v53 = vld [vmem:[%s5014_s1 + $0x230] ss:$8 sps:$4 sm:$0xff]   ;;  %v89_v6 = vld [vmem:[%s5015_s0 + $0x1c0] sm:$0xff] }
  0x22   :  { %v96_v8 = vld [vmem:[%s5015_s0 + $0x1f8] sm:$0xff]  ;;  %v111_v12 = vld [vmem:[%s5015_s0 + $0x270] sm:$0xff]  ;;  %v106_v13 = vld [vmem:[%s5015_s0 + $0x248] sm:$0xff] }
  0x23   :  { %1035 = vmatpush2.bf16.msra.mxu0 %v3236_v34  ;;  %v266_v34 = vpack.c.bf16 %v56_v26, %v49_v25  ;;  %v113_v14 = vld [vmem:[%s5015_s0 + $0x280] sm:$0xff]  ;;  %v103_v22 = vld [vmem:[%s5015_s0 + $0x230] sm:$0xff]  ;;  %v112_v26 = vld [vmem:[%s5015_s0 + $0x278] sm:$0xff] }
  0x24   :  { %1228 = vmatpush2.bf16.msra.mxu1 %v3237_v35  ;;  %1036 = vmatprep.subr.bf16.mxu0 %v3238_v36  ;;  %v272_v35 = vpack.c.bf16 %v69_v29, %v62_v28  ;;  %v274_v36 = vpack.c.bf16 %v71_v31, %v64_v30  ;;  %v3304_v15 = vld [vmem:[%s5014_s1 + $0x200] ss:$8 sps:$4 sm:$0xff]   ;;  %v3312_v23 = vld [vmem:[%s5014_s1 + $0x2e4] ss:$8 sps:$4 sm:$0xff]   ;;  %v120_v29 = vld [vmem:[%s5015_s0 + $0x2b8] sm:$0xff] }
  0x25   :  { %1229 = vmatprep.subr.bf16.mxu1 %v3240_v37  ;;  %v3289_v37 = vld [vmem:[%s5014_s1 + $0x250] ss:$8 sps:$4 sm:$0xff]   ;;  %v105_v25 = vld [vmem:[%s5015_s0 + $0x240] sm:$0xff] }
  0x26   :  { %v125_v28 = vld [vmem:[%s5015_s0 + $0x2e0] sm:$0xff]  ;;  %v127_v30 = vld [vmem:[%s5015_s0 + $0x2f0] sm:$0xff] }
  0x27   :  { %1037 = vmatpush2.bf16.msra.mxu0 %v3242_v38  ;;  %v61_v38 = vld [vmem:[%s5015_s0 + $0xe0] sm:$0xff] }
  0x28   :  { %1230 = vmatpush2.bf16.msra.mxu1 %v3243_v39  ;;  %1038 = vmatprep.subr.bf16.mxu0 %v3244_v40  ;;  %v3294_v39 = vld [vmem:[%s5014_s1 + $0x244] ss:$8 sps:$4 sm:$0xff]   ;;  %v68_v40 = vld [vmem:[%s5015_s0 + $0x118] sm:$0xff]  ;;  %v3310_v31 = vld [vmem:[%s5014_s1 + $0x2e0] ss:$8 sps:$4 sm:$0xff]  }
  0x29   :  { %1231 = vmatprep.subr.bf16.mxu1 %v3246_v41  ;;  %v63_v41 = vld [vmem:[%s5015_s0 + $0xf0] sm:$0xff]  ;;  %v271_v49 = vpack.c.bf16 %v68_v40, %v61_v38  ;;  %v117_v38 = vld [vmem:[%s5015_s0 + $0x2a0] sm:$0xff]  ;;  %v124_v40 = vld [vmem:[%s5015_s0 + $0x2d8] sm:$0xff] }
  0x2b   :  { %1039 = vmatpush2.bf16.msra.mxu0 %v3248_v42  ;;  %v70_v42 = vld [vmem:[%s5015_s0 + $0x128] sm:$0xff] }
  0x2c   :  { %1232 = vmatpush2.bf16.msra.mxu1 %v3249_v43  ;;  %1040 = vmatprep.subr.bf16.mxu0 %v3250_v44  ;;  %v76_v43 = vld [vmem:[%s5015_s0 + $0x158] sm:$0xff]  ;;  %v83_v44 = vld [vmem:[%s5015_s0 + $0x190] sm:$0xff] }
  0x2d   :  { %1233 = vmatprep.subr.bf16.mxu1 %v3252_v45  ;;  %v78_v45 = vld [vmem:[%s5015_s0 + $0x168] sm:$0xff] }
  0x2f   :  { %1041 = vmatpush2.bf16.msra.mxu0 %v3254_v50  ;;  %v273_v50 = vpack.c.bf16 %v70_v42, %v63_v41  ;;  %v119_v41 = vld [vmem:[%s5015_s0 + $0x2b0] sm:$0xff]  ;;  %v126_v42 = vld [vmem:[%s5015_s0 + $0x2e8] sm:$0xff] }
  0x30   :  { %1234 = vmatpush2.bf16.msra.mxu1 %v3255_v51  ;;  %1042 = vmatprep.subr.bf16.mxu0 %v3256_v52  ;;  %v279_v51 = vpack.c.bf16 %v83_v44, %v76_v43  ;;  %v281_v52 = vpack.c.bf16 %v85_v46, %v78_v45  ;;  %v132_v43 = vld [vmem:[%s5015_s0 + $0x318] sm:$0xff]  ;;  %v139_v44 = vld [vmem:[%s5015_s0 + $0x350] sm:$0xff]  ;;  %v134_v45 = vld [vmem:[%s5015_s0 + $0x328] sm:$0xff] }
  0x31   :  { %1235 = vmatprep.subr.bf16.mxu1 %v3258_v55  ;;  %v3300_v55 = vld [vmem:[%s5014_s1 + $0x224] ss:$8 sps:$4 sm:$0xff]  }
  0x32   :  { %v141_v46 = vld [vmem:[%s5015_s0 + $0x360] sm:$0xff] }
  0x33   :  { %1043 = vmatpush2.bf16.msra.mxu0 %v3260_v56  ;;  %v82_v56 = vld [vmem:[%s5015_s0 + $0x188] sm:$0xff] }
  0x34   :  { %1236 = vmatpush2.bf16.msra.mxu1 %v3261_v57  ;;  %1044 = vmatprep.subr.bf16.mxu0 %v3262_v58  ;;  %v77_v57 = vld [vmem:[%s5015_s0 + $0x160] sm:$0xff]  ;;  %v84_v58 = vld [vmem:[%s5015_s0 + $0x198] sm:$0xff] }
  0x35   :  { %1237 = vmatprep.subr.bf16.mxu1 %v3264_v59  ;;  %v90_v59 = vld [vmem:[%s5015_s0 + $0x1c8] sm:$0xff] }
  0x37   :  { %1045 = vmatpush2.bf16.msra.mxu0 %v3266_v60  ;;  %v97_v60 = vld [vmem:[%s5015_s0 + $0x200] sm:$0xff] }
  0x38   :  { %1238 = vmatpush2.bf16.msra.mxu1 %v3267_v61  ;;  %1046 = vmatprep.subr.bf16.mxu0 %v3268_v62  ;;  %v92_v61 = vld [vmem:[%s5015_s0 + $0x1d8] sm:$0xff]  ;;  %v99_v62 = vld [vmem:[%s5015_s0 + $0x210] sm:$0xff] }
  0x39   :  { %1239 = vmatprep.subr.bf16.mxu1 %v3270_v63  ;;  %v3298_v63 = vld [vmem:[%s5014_s1 + $0x220] ss:$8 sps:$4 sm:$0xff]  }
  0x3b   :  { %1047 = vmatpush2.bf16.msra.mxu0 %v3272_v0  ;;  %v3303_v0 = vld [vmem:[%s5014_s1 + $0x214] ss:$8 sps:$4 sm:$0xff]  }
  0x3c   :  { %1240 = vmatpush2.bf16.msra.mxu1 %v3273_v1  ;;  %1048 = vmatprep.subr.bf16.mxu0 %v3274_v2  ;;  %v278_v1 = vpack.c.bf16 %v82_v56, %v75_v54  ;;  %v280_v2 = vpack.c.bf16 %v84_v58, %v77_v57  ;;  %v3324_v54 = vld [vmem:[%s5014_s1 + $0x2a4] ss:$8 sps:$4 sm:$0xff]   ;;  %v140_v58 = vld [vmem:[%s5015_s0 + $0x358] sm:$0xff] }
  0x3d   :  { %1241 = vmatprep.subr.bf16.mxu1 %v3276_v3  ;;  %v286_v3 = vpack.c.bf16 %v97_v60, %v90_v59  ;;  %v138_v56 = vld [vmem:[%s5015_s0 + $0x348] sm:$0xff]  ;;  %v133_v57 = vld [vmem:[%s5015_s0 + $0x320] sm:$0xff] }
  0x3e   :  { %v146_v59 = vld [vmem:[%s5015_s0 + $0x388] sm:$0xff]  ;;  %v153_v60 = vld [vmem:[%s5015_s0 + $0x3c0] sm:$0xff] }
  0x3f   :  { %1049 = vmatpush2.bf16.msra.mxu0 %v3278_v4  ;;  %v288_v4 = vpack.c.bf16 %v99_v62, %v92_v61  ;;  %v148_v61 = vld [vmem:[%s5015_s0 + $0x398] sm:$0xff]  ;;  %v155_v62 = vld [vmem:[%s5015_s0 + $0x3d0] sm:$0xff] }
  0x40   :  { %1242 = vmatpush2.bf16.msra.mxu1 %v3279_v5  ;;  %1404 = vmatprep.subr.bf16.mxu0 %v3282_v10  ;;  %v3301_v5 = vld [vmem:[%s5014_s1 + $0x210] ss:$8 sps:$4 sm:$0xff]   ;;  %v98_v10 = vld [vmem:[%s5015_s0 + $0x208] sm:$0xff] }
  0x41   :  { %1611 = vmatprep.subr.bf16.mxu1 %v3285_v11  ;;  %v104_v11 = vld [vmem:[%s5015_s0 + $0x238] sm:$0xff] }
  0x42   :  { %1051 = vmatmul.mubr.bf16.vlgmr.msra.gmra.mxu0 %v257_v16  ;;  %v3309_v16 = vld [vmem:[%s5014_s1 + $0x2f4] ss:$8 sps:$4 sm:$0xff]  }
  0x43   :  { %1244 = vmatmul.mubr.bf16.vlgmr.msra.gmra.mxu1 %v259_v17  ;;  %1405 = vmatpush1.bf16.msra.mxu0 %v3280_v18  ;;  %v285_v17 = vpack.c.bf16 %v96_v8, %v89_v6  ;;  %v287_v18 = vpack.c.bf16 %v98_v10, %v91_v9  ;;  %v3330_v6 = vld [vmem:[%s5014_s1 + $0x284] ss:$8 sps:$4 sm:$0xff]   ;;  %v152_v8 = vld [vmem:[%s5015_s0 + $0x3b8] sm:$0xff]  ;;  %v147_v9 = vld [vmem:[%s5015_s0 + $0x390] sm:$0xff] }
  0x44   :  { %1612 = vmatpush1.bf16.msra.mxu1 %v3283_v19  ;;  %1060 = vmatprep.mubr.bf16.mxu0 %v265_v20  ;;  %v293_v19 = vpack.c.bf16 %v111_v12, %v104_v11  ;;  %v295_v20 = vpack.c.bf16 %v113_v14, %v106_v13  ;;  %v154_v10 = vld [vmem:[%s5015_s0 + $0x3c8] sm:$0xff]  ;;  %v160_v11 = vld [vmem:[%s5015_s0 + $0x3f8] sm:$0xff]  ;;  %v167_v12 = vld [vmem:[%s5015_s0 + $0x430] sm:$0xff] }
  0x45   :  { %1253 = vmatprep.mubr.bf16.mxu1 %v267_v21  ;;  %1406 = vmatprep.subr.bf16.mxu0 %v3288_v24  ;;  %v3307_v21 = vld [vmem:[%s5014_s1 + $0x2f0] ss:$8 sps:$4 sm:$0xff]   ;;  %v110_v24 = vld [vmem:[%s5015_s0 + $0x268] sm:$0xff]  ;;  %v169_v14 = vld [vmem:[%s5015_s0 + $0x440] sm:$0xff] }
  0x46   :  { %v162_v13 = vld [vmem:[%s5015_s0 + $0x408] sm:$0xff] }
  0x47   :  { %1407 = vmatpush1.bf16.msra.mxu0 %v3286_v27  ;;  %v118_v27 = vld [vmem:[%s5015_s0 + $0x2a8] sm:$0xff] }
  0x48   :  { %1408 = vmatprep.subr.bf16.mxu0 %v3291_v32  ;;  %v3315_v32 = vld [vmem:[%s5014_s1 + $0x2d4] ss:$8 sps:$4 sm:$0xff]  }
  0x4a   :  { %1061 = vmatmul.mubr.bf16.gmra.mxu0 %v264_v33  ;;  %v292_v33 = vpack.c.bf16 %v110_v24, %v103_v22  ;;  %v161_v22 = vld [vmem:[%s5015_s0 + $0x400] sm:$0xff]  ;;  %v174_v24 = vld [vmem:[%s5015_s0 + $0x468] sm:$0xff] }
  0x4b   :  { %1254 = vmatmul.mubr.bf16.gmra.mxu1 %v266_v34  ;;  %1070 = vmatprep.mubr.bf16.mxu0 %v272_v35  ;;  %v294_v34 = vpack.c.bf16 %v112_v26, %v105_v25  ;;  %v300_v35 = vpack.c.bf16 %v125_v28, %v118_v27  ;;  %v181_v25 = vld [vmem:[%s5015_s0 + $0x4a0] sm:$0xff]  ;;  %v176_v26 = vld [vmem:[%s5015_s0 + $0x478] sm:$0xff]  ;;  %v183_v27 = vld [vmem:[%s5015_s0 + $0x4b0] sm:$0xff] }
  0x4c   :  { %1263 = vmatprep.mubr.bf16.mxu1 %v274_v36  ;;  %1409 = vmatpush1.bf16.msra.mxu0 %v3289_v37  ;;  %v302_v36 = vpack.c.bf16 %v127_v30, %v120_v29  ;;  %v3313_v37 = vld [vmem:[%s5014_s1 + $0x2d0] ss:$8 sps:$4 sm:$0xff]   ;;  %v328_v30 = vpack.c.bf16 %v181_v25, %v174_v24  ;;  %v253_v24 = vld [vmem:[%s5015_s0 + $0x6e0] sm:$0xff] }
  0x4d   :  { %1410 = vmatprep.subr.bf16.mxu0 %v3294_v39  ;;  %v3318_v39 = vld [vmem:[%s5014_s1 + $0x2c4] ss:$8 sps:$4 sm:$0xff]  }
  0x50   :  { %1411 = vmatpush1.bf16.msra.mxu0 %v3292_v47  ;;  %v3316_v47 = vld [vmem:[%s5014_s1 + $0x2c0] ss:$8 sps:$4 sm:$0xff]  }
  0x51   :  { %1412 = vmatprep.subr.bf16.mxu0 %v3297_v48  ;;  %v3321_v48 = vld [vmem:[%s5014_s1 + $0x2b4] ss:$8 sps:$4 sm:$0xff]  }
  0x52   :  { %1071 = vmatmul.mubr.bf16.gmra.mxu0 %v271_v49  ;;  %v299_v49 = vpack.c.bf16 %v124_v40, %v117_v38  ;;  %v190_v38 = vld [vmem:[%s5015_s0 + $0x4e8] sm:$0xff] }
  0x53   :  { %1264 = vmatmul.mubr.bf16.gmra.mxu1 %v273_v50  ;;  %1080 = vmatprep.mubr.bf16.mxu0 %v279_v51  ;;  %v301_v50 = vpack.c.bf16 %v126_v42, %v119_v41  ;;  %v307_v51 = vpack.c.bf16 %v139_v44, %v132_v43  ;;  %v187_v44 = vld [vmem:[%s5015_s0 + $0x4d0] sm:$0xff] }
  0x54   :  { %1273 = vmatprep.mubr.bf16.mxu1 %v281_v52  ;;  %1413 = vmatpush1.bf16.msra.mxu0 %v3295_v53  ;;  %v309_v52 = vpack.c.bf16 %v141_v46, %v134_v45  ;;  %v3319_v53 = vld [vmem:[%s5014_s1 + $0x2b0] ss:$8 sps:$4 sm:$0xff]   ;;  %v194_v45 = vld [vmem:[%s5015_s0 + $0x508] sm:$0xff]  ;;  %v189_v46 = vld [vmem:[%s5015_s0 + $0x4e0] sm:$0xff] }
  0x55   :  { %1414 = vmatprep.subr.bf16.mxu0 %v3300_v55  ;;  %v131_v55 = vld [vmem:[%s5015_s0 + $0x310] sm:$0xff] }
  0x58   :  { %1415 = vmatpush1.bf16.msra.mxu0 %v3298_v63  ;;  %v3322_v63 = vld [vmem:[%s5014_s1 + $0x2a0] ss:$8 sps:$4 sm:$0xff]  }
  0x59   :  { %1416 = vmatprep.subr.bf16.mxu0 %v3303_v0  ;;  %v3327_v0 = vld [vmem:[%s5014_s1 + $0x294] ss:$8 sps:$4 sm:$0xff]  }
  0x5a   :  { %1081 = vmatmul.mubr.bf16.gmra.mxu0 %v278_v1  ;;  %v306_v1 = vpack.c.bf16 %v138_v56, %v131_v55 }
  0x5b   :  { %1274 = vmatmul.mubr.bf16.gmra.mxu1 %v280_v2  ;;  %1090 = vmatprep.mubr.bf16.mxu0 %v286_v3  ;;  %v308_v2 = vpack.c.bf16 %v140_v58, %v133_v57  ;;  %v314_v3 = vpack.c.bf16 %v153_v60, %v146_v59  ;;  %v201_v57 = vld [vmem:[%s5015_s0 + $0x540] sm:$0xff]  ;;  %v208_v58 = vld [vmem:[%s5015_s0 + $0x578] sm:$0xff]  ;;  %v203_v59 = vld [vmem:[%s5015_s0 + $0x550] sm:$0xff] }
  0x5c   :  { %1283 = vmatprep.mubr.bf16.mxu1 %v288_v4  ;;  %1417 = vmatpush1.bf16.msra.mxu0 %v3301_v5  ;;  %v316_v4 = vpack.c.bf16 %v155_v62, %v148_v61  ;;  %v3325_v5 = vld [vmem:[%s5014_s1 + $0x290] ss:$8 sps:$4 sm:$0xff]   ;;  %v210_v60 = vld [vmem:[%s5015_s0 + $0x588] sm:$0xff] }
  0x5d   :  { %1418 = vmatprep.subr.bf16.mxu0 %v3306_v7  ;;  %v145_v7 = vld [vmem:[%s5015_s0 + $0x380] sm:$0xff]  ;;  %v216_v61 = vld [vmem:[%s5015_s0 + $0x5b8] sm:$0xff]  ;;  %v223_v62 = vld [vmem:[%s5015_s0 + $0x5f0] sm:$0xff] }
  0x60   :  { %1419 = vmatpush1.bf16.msra.mxu0 %v3304_v15  ;;  %v3328_v15 = vld [vmem:[%s5014_s1 + $0x280] ss:$8 sps:$4 sm:$0xff]  }
  0x61   :  { %1420 = vmatprep.subr.bf16.mxu0 %v3309_v16  ;;  %v313_v16 = vpack.c.bf16 %v152_v8, %v145_v7  ;;  %v217_v7 = vld [vmem:[%s5015_s0 + $0x5c0] sm:$0xff]  ;;  %v224_v8 = vld [vmem:[%s5015_s0 + $0x5f8] sm:$0xff] }
  0x62   :  { %1091 = vmatmul.mubr.bf16.gmra.mxu0 %v285_v17  ;;  %v315_v17 = vpack.c.bf16 %v154_v10, %v147_v9  ;;  %v230_v9 = vld [vmem:[%s5015_s0 + $0x628] sm:$0xff]  ;;  %v237_v10 = vld [vmem:[%s5015_s0 + $0x660] sm:$0xff] }
  0x63   :  { %1284 = vmatmul.mubr.bf16.gmra.mxu1 %v287_v18  ;;  %1100 = vmatprep.mubr.bf16.mxu0 %v293_v19  ;;  %v321_v18 = vpack.c.bf16 %v167_v12, %v160_v11  ;;  %v323_v19 = vpack.c.bf16 %v169_v14, %v162_v13  ;;  %v232_v11 = vld [vmem:[%s5015_s0 + $0x638] sm:$0xff]  ;;  %v239_v12 = vld [vmem:[%s5015_s0 + $0x670] sm:$0xff]  ;;  %v350_v14 = vpack.c.bf16 %v224_v8, %v217_v7 }
  0x64   :  { %1293 = vmatprep.mubr.bf16.mxu1 %v295_v20  ;;  %1421 = vmatpush2.bf16.msra.mxu0 %v3307_v21  ;;  %v159_v20 = vld [vmem:[%s5015_s0 + $0x3f0] sm:$0xff]  ;;  %v166_v21 = vld [vmem:[%s5015_s0 + $0x428] sm:$0xff] }
  0x65   :  { %1422 = vmatprep.subr.bf16.mxu0 %v3312_v23  ;;  %v168_v23 = vld [vmem:[%s5015_s0 + $0x438] sm:$0xff]  ;;  %v320_v28 = vpack.c.bf16 %v166_v21, %v159_v20  ;;  %v238_v20 = vld [vmem:[%s5015_s0 + $0x668] sm:$0xff] }
  0x66   :  { %v322_v29 = vpack.c.bf16 %v168_v23, %v161_v22  ;;  %v244_v21 = vld [vmem:[%s5015_s0 + $0x698] sm:$0xff]  ;;  %v251_v22 = vld [vmem:[%s5015_s0 + $0x6d0] sm:$0xff]  ;;  %v246_v23 = vld [vmem:[%s5015_s0 + $0x6a8] sm:$0xff] }
  0x68   :  { %1423 = vmatpush2.bf16.msra.mxu0 %v3310_v31  ;;  %v330_v31 = vpack.c.bf16 %v183_v27, %v176_v26  ;;  %v363_v27 = vpack.c.bf16 %v251_v22, %v244_v21  ;;  %v100_v21 = vld [vmem:[%s5015_s0 + $0x218] sm:$0xff]  ;;  %v95_v22 = vld [vmem:[%s5015_s0 + $0x1f0] sm:$0xff] }
  0x69   :  { %1424 = vmatprep.subr.bf16.mxu0 %v3315_v32  ;;  %v173_v32 = vld [vmem:[%s5015_s0 + $0x460] sm:$0xff] }
  0x6a   :  { %1101 = vmatmul.mubr.bf16.gmra.mxu0 %v292_v33  ;;  %v180_v33 = vld [vmem:[%s5015_s0 + $0x498] sm:$0xff] }
  0x6b   :  { %1294 = vmatmul.mubr.bf16.gmra.mxu1 %v294_v34  ;;  %1110 = vmatprep.mubr.bf16.mxu0 %v300_v35  ;;  %v175_v34 = vld [vmem:[%s5015_s0 + $0x470] sm:$0xff]  ;;  %v182_v35 = vld [vmem:[%s5015_s0 + $0x4a8] sm:$0xff]  ;;  %v327_v40 = vpack.c.bf16 %v180_v33, %v173_v32  ;;  %v252_v32 = vld [vmem:[%s5015_s0 + $0x6d8] sm:$0xff] }
  0x6c   :  { %1303 = vmatprep.mubr.bf16.mxu1 %v302_v36  ;;  %1425 = vmatpush2.bf16.msra.mxu0 %v3313_v37  ;;  %v188_v36 = vld [vmem:[%s5015_s0 + $0x4d8] sm:$0xff]  ;;  %v195_v37 = vld [vmem:[%s5015_s0 + $0x510] sm:$0xff]  ;;  %v329_v41 = vpack.c.bf16 %v182_v35, %v175_v34  ;;  %v38_v33 = vld [vmem:[%s5015_s0 + $0x28] sm:$0xff] }
  0x6d   :  { %1426 = vmatprep.subr.bf16.mxu0 %v3318_v39  ;;  %v197_v39 = vld [vmem:[%s5015_s0 + $0x520] sm:$0xff]  ;;  %v335_v42 = vpack.c.bf16 %v195_v37, %v188_v36 }
  0x6e   :  { %v337_v43 = vpack.c.bf16 %v197_v39, %v190_v38  ;;  %v45_v34 = vld [vmem:[%s5015_s0 + $0x60] sm:$0xff]  ;;  %v3363_v39 = vmov 0  }
  0x6f   :  { %v262_v37 = vpack.c.bf16 %v45_v34, %v38_v33  ;;  %v37_v38 = vld [vmem:[%s5015_s0 + $0x20] sm:$0xff]  ;;  %v122_v33 = vld [vmem:[%s5015_s0 + $0x2c8] sm:$0xff] }
  0x70   :  { %1427 = vmatpush2.bf16.msra.mxu0 %v3316_v47  ;;  %v196_v47 = vld [vmem:[%s5015_s0 + $0x518] sm:$0xff]  ;;  %v129_v34 = vld [vmem:[%s5015_s0 + $0x300] sm:$0xff] }
  0x71   :  { %1428 = vmatprep.subr.bf16.mxu0 %v3321_v48  ;;  %v202_v48 = vld [vmem:[%s5015_s0 + $0x548] sm:$0xff] }
  0x72   :  { %1111 = vmatmul.mubr.bf16.gmra.mxu0 %v299_v49  ;;  %v209_v49 = vld [vmem:[%s5015_s0 + $0x580] sm:$0xff] }
  0x73   :  { %1304 = vmatmul.mubr.bf16.gmra.mxu1 %v301_v50  ;;  %1120 = vmatprep.mubr.bf16.mxu0 %v307_v51  ;;  %v204_v50 = vld [vmem:[%s5015_s0 + $0x558] sm:$0xff]  ;;  %v211_v51 = vld [vmem:[%s5015_s0 + $0x590] sm:$0xff]  ;;  %v342_v55 = vpack.c.bf16 %v209_v49, %v202_v48 }
  0x74   :  { %1313 = vmatprep.mubr.bf16.mxu1 %v309_v52  ;;  %1429 = vmatpush2.bf16.msra.mxu0 %v3319_v53  ;;  %v334_v52 = vpack.c.bf16 %v194_v45, %v187_v44  ;;  %v336_v53 = vpack.c.bf16 %v196_v47, %v189_v46  ;;  %v344_v56 = vpack.c.bf16 %v211_v51, %v204_v50  ;;  %v59_v44 = vld [vmem:[%s5015_s0 + $0xd0] sm:$0xff]  ;;  %v3332_v48 = vld [vmem:[%s5016_s3 + $0x38] sm:$0xff]   ;;  %v58_v51 = vld [vmem:[%s5015_s0 + $0xc8] sm:$0xff] }
  0x75   :  { %1430 = vmatprep.subr.bf16.mxu0 %v3324_v54  ;;  %v3331_v54 = vld [vmem:[%s5016_s3 + $0x78] sm:$0xff]   ;;  %v3333_v49 = vld [vmem:[%s5016_s3 + $0x70] sm:$0xff]  }
  0x76   :  { %v51_v50 = vld [vmem:[%s5015_s0 + $0x90] sm:$0xff] }
  0x78   :  { %1431 = vmatpush2.bf16.msra.mxu0 %v3322_v63  ;;  %v218_v63 = vld [vmem:[%s5015_s0 + $0x5c8] sm:$0xff] }
  0x79   :  { %1432 = vmatprep.subr.bf16.mxu0 %v3327_v0  ;;  %v225_v0 = vld [vmem:[%s5015_s0 + $0x600] sm:$0xff] }
  0x7a   :  { %1121 = vmatmul.mubr.bf16.gmra.mxu0 %v306_v1  ;;  %v341_v1 = vpack.c.bf16 %v208_v58, %v201_v57  ;;  %v3335_v57 = vld [vmem:[%s5016_s3 + $0x68] sm:$0xff]   ;;  %v268_v58 = vpack.c.bf16 %v58_v51, %v51_v50  ;;  %v135_v50 = vld [vmem:[%s5015_s0 + $0x330] sm:$0xff] }
  0x7b   :  { %1314 = vmatmul.mubr.bf16.gmra.mxu1 %v308_v2  ;;  %1130 = vmatprep.mubr.bf16.mxu0 %v314_v3  ;;  %v343_v2 = vpack.c.bf16 %v210_v60, %v203_v59  ;;  %v349_v3 = vpack.c.bf16 %v223_v62, %v216_v61  ;;  %v3336_v61 = vld [vmem:[%s5016_s3 + $0x28] sm:$0xff]   ;;  %v3337_v62 = vld [vmem:[%s5016_s3 + $0x60] sm:$0xff]  }
  0x7c   :  { %1323 = vmatprep.mubr.bf16.mxu1 %v316_v4  ;;  %1433 = vmatpush2.bf16.msra.mxu0 %v3325_v5  ;;  %v351_v4 = vpack.c.bf16 %v225_v0, %v218_v63  ;;  %v215_v5 = vld [vmem:[%s5015_s0 + $0x5b0] sm:$0xff]  ;;  %v65_v63 = vld [vmem:[%s5015_s0 + $0x100] sm:$0xff]  ;;  %v72_v0 = vld [vmem:[%s5015_s0 + $0x138] sm:$0xff] }
  0x7d   :  { %1434 = vmatprep.subr.bf16.mxu0 %v3330_v6  ;;  %v222_v6 = vld [vmem:[%s5015_s0 + $0x5e8] sm:$0xff] }
  0x7e   :  { %v348_v13 = vpack.c.bf16 %v222_v6, %v215_v5  ;;  %v3338_v5 = vld [vmem:[%s5016_s3 + $0x20] sm:$0xff]   ;;  %v275_v6 = vpack.c.bf16 %v72_v0, %v65_v63  ;;  %v142_v51 = vld [vmem:[%s5015_s0 + $0x368] sm:$0xff] }
  0x7f   :  { %v149_v63 = vld [vmem:[%s5015_s0 + $0x3a0] sm:$0xff] }
  0x80   :  { %1435 = vmatpush2.bf16.msra.mxu0 %v3328_v15  ;;  %v356_v15 = vpack.c.bf16 %v237_v10, %v230_v9  ;;  %v79_v9 = vld [vmem:[%s5015_s0 + $0x170] sm:$0xff]  ;;  %v86_v10 = vld [vmem:[%s5015_s0 + $0x1a8] sm:$0xff] }
  0x81   :  { %2927 = vmatprep.subr.bf16.mxu0 %v3331_v54  ;;  %v66_v54 = vld [vmem:[%s5015_s0 + $0x108] sm:$0xff] }
  0x82   :  { %1131 = vmatmul.mubr.bf16.gmra.mxu0 %v313_v16  ;;  %v358_v16 = vpack.c.bf16 %v239_v12, %v232_v11  ;;  %v81_v11 = vld [vmem:[%s5015_s0 + $0x180] sm:$0xff]  ;;  %v88_v12 = vld [vmem:[%s5015_s0 + $0x1b8] sm:$0xff] }
  0x83   :  { %1324 = vmatmul.mubr.bf16.gmra.mxu1 %v315_v17  ;;  %1140 = vmatprep.mubr.bf16.mxu0 %v321_v18  ;;  %v229_v17 = vld [vmem:[%s5015_s0 + $0x620] sm:$0xff]  ;;  %v236_v18 = vld [vmem:[%s5015_s0 + $0x658] sm:$0xff] }
  0x84   :  { %1333 = vmatprep.mubr.bf16.mxu1 %v323_v19  ;;  %v231_v19 = vld [vmem:[%s5015_s0 + $0x630] sm:$0xff]  ;;  %v355_v25 = vpack.c.bf16 %v236_v18, %v229_v17  ;;  %v282_v17 = vpack.c.bf16 %v86_v10, %v79_v9  ;;  %v284_v18 = vpack.c.bf16 %v88_v12, %v81_v11 }
  0x85   :  { %v357_v26 = vpack.c.bf16 %v238_v20, %v231_v19  ;;  %v93_v20 = vld [vmem:[%s5015_s0 + $0x1e0] sm:$0xff] }
  0x8a   :  { %1141 = vmatmul.mubr.bf16.gmra.mxu0 %v320_v28  ;;  %v365_v28 = vpack.c.bf16 %v253_v24, %v246_v23  ;;  %v102_v23 = vld [vmem:[%s5015_s0 + $0x228] sm:$0xff]  ;;  %v108_v24 = vld [vmem:[%s5015_s0 + $0x258] sm:$0xff] }
  0x8b   :  { %1334 = vmatmul.mubr.bf16.gmra.mxu1 %v322_v29  ;;  %1150 = vmatprep.mubr.bf16.mxu0 %v328_v30  ;;  %v243_v29 = vld [vmem:[%s5015_s0 + $0x690] sm:$0xff]  ;;  %v250_v30 = vld [vmem:[%s5015_s0 + $0x6c8] sm:$0xff] }
  0x8c   :  { %1343 = vmatprep.mubr.bf16.mxu1 %v330_v31  ;;  %v245_v31 = vld [vmem:[%s5015_s0 + $0x6a0] sm:$0xff]  ;;  %v362_v35 = vpack.c.bf16 %v250_v30, %v243_v29  ;;  %v107_v29 = vld [vmem:[%s5015_s0 + $0x250] sm:$0xff]  ;;  %v114_v30 = vld [vmem:[%s5015_s0 + $0x288] sm:$0xff] }
  0x8d   :  { %v364_v36 = vpack.c.bf16 %v252_v32, %v245_v31  ;;  %v109_v31 = vld [vmem:[%s5015_s0 + $0x260] sm:$0xff]  ;;  %v116_v32 = vld [vmem:[%s5015_s0 + $0x298] sm:$0xff] }
  0x92   :  { %1151 = vmatmul.mubr.bf16.gmra.mxu0 %v327_v40  ;;  %v44_v40 = vld [vmem:[%s5015_s0 + $0x58] sm:$0xff] }
  0x93   :  { %1344 = vmatmul.mubr.bf16.gmra.mxu1 %v329_v41  ;;  %1160 = vmatprep.mubr.bf16.mxu0 %v335_v42  ;;  %v39_v41 = vld [vmem:[%s5015_s0 + $0x30] sm:$0xff]  ;;  %v46_v42 = vld [vmem:[%s5015_s0 + $0x68] sm:$0xff]  ;;  %v261_v45 = vpack.c.bf16 %v44_v40, %v37_v38  ;;  %v298_v38 = vpack.c.bf16 %v116_v32, %v109_v31  ;;  %v304_v40 = vpack.c.bf16 %v129_v34, %v122_v33  ;;  %v3345_v33 = vld [vmem:[%s5016_s3 + $0x40] sm:$0xff]  }
  0x94   :  { %1353 = vmatprep.mubr.bf16.mxu1 %v337_v43  ;;  %v52_v43 = vld [vmem:[%s5015_s0 + $0x98] sm:$0xff]  ;;  %v263_v46 = vpack.c.bf16 %v46_v42, %v39_v41  ;;  %v121_v41 = vld [vmem:[%s5015_s0 + $0x2c0] sm:$0xff] }
  0x95   :  { %v269_v47 = vpack.c.bf16 %v59_v44, %v52_v43  ;;  %v128_v42 = vld [vmem:[%s5015_s0 + $0x2f8] sm:$0xff]  ;;  %v123_v43 = vld [vmem:[%s5015_s0 + $0x2d0] sm:$0xff]  ;;  %v130_v44 = vld [vmem:[%s5015_s0 + $0x308] sm:$0xff] }
  0x9a   :  { %1161 = vmatmul.mubr.bf16.gmra.mxu0 %v334_v52  ;;  %v53_v52 = vld [vmem:[%s5015_s0 + $0xa0] sm:$0xff] }
  0x9b   :  { %1354 = vmatmul.mubr.bf16.gmra.mxu1 %v336_v53  ;;  %1170 = vmatprep.mubr.bf16.mxu0 %v342_v55  ;;  %v60_v53 = vld [vmem:[%s5015_s0 + $0xd8] sm:$0xff]  ;;  %v73_v55 = vld [vmem:[%s5015_s0 + $0x140] sm:$0xff] }
  0x9c   :  { %1363 = vmatprep.mubr.bf16.mxu1 %v344_v56  ;;  %v3334_v56 = vld [vmem:[%s5016_s3 + $0x30] sm:$0xff]   ;;  %v270_v59 = vpack.c.bf16 %v60_v53, %v53_v52  ;;  %v276_v60 = vpack.c.bf16 %v73_v55, %v66_v54  ;;  %v137_v52 = vld [vmem:[%s5015_s0 + $0x340] sm:$0xff]  ;;  %v144_v53 = vld [vmem:[%s5015_s0 + $0x378] sm:$0xff]  ;;  %v469_v54 = vlaneseq }
  0x9d   :  { %v150_v55 = vld [vmem:[%s5015_s0 + $0x3a8] sm:$0xff] }
  0xa2   :  { %1171 = vmatmul.mubr.bf16.gmra.mxu0 %v341_v1  ;;  %v67_v1 = vld [vmem:[%s5015_s0 + $0x110] sm:$0xff] }
  0xa3   :  { %1364 = vmatmul.mubr.bf16.gmra.mxu1 %v343_v2  ;;  %1180 = vmatprep.mubr.bf16.mxu0 %v349_v3  ;;  %v74_v2 = vld [vmem:[%s5015_s0 + $0x148] sm:$0xff]  ;;  %v80_v3 = vld [vmem:[%s5015_s0 + $0x178] sm:$0xff] }
  0xa4   :  { %1373 = vmatprep.mubr.bf16.mxu1 %v351_v4  ;;  %v87_v4 = vld [vmem:[%s5015_s0 + $0x1b0] sm:$0xff]  ;;  %v277_v7 = vpack.c.bf16 %v74_v2, %v67_v1  ;;  %v156_v1 = vld [vmem:[%s5015_s0 + $0x3d8] sm:$0xff] }
  0xa5   :  { %v283_v8 = vpack.c.bf16 %v87_v4, %v80_v3  ;;  %v151_v2 = vld [vmem:[%s5015_s0 + $0x3b0] sm:$0xff]  ;;  %v158_v3 = vld [vmem:[%s5015_s0 + $0x3e8] sm:$0xff]  ;;  %v467_v4 = vld [vmem:[%s5017_s2] sm:$0x3] }
  0xa6   :  { %v319_v9 = vpack.c.bf16 %v158_v3, %v151_v2  ;;  %v191_v3 = vld [vmem:[%s5015_s0 + $0x4f0] sm:$0xff] }
  0xaa   :  { %1181 = vmatmul.mubr.bf16.gmra.mxu0 %v348_v13  ;;  %v94_v13 = vld [vmem:[%s5015_s0 + $0x1e8] sm:$0xff] }
  0xab   :  { %1374 = vmatmul.mubr.bf16.gmra.mxu1 %v350_v14  ;;  %1190 = vmatprep.mubr.bf16.mxu0 %v356_v15  ;;  %v101_v14 = vld [vmem:[%s5015_s0 + $0x220] sm:$0xff]  ;;  %v3339_v15 = vld [vmem:[%s5016_s3 + $0x58] sm:$0xff]  }
  0xac   :  { %1383 = vmatprep.mubr.bf16.mxu1 %v358_v16  ;;  %v3340_v16 = vld [vmem:[%s5016_s3 + $0x18] sm:$0xff]   ;;  %v290_v19 = vpack.c.bf16 %v101_v14, %v94_v13 }
  0xb2   :  { %1191 = vmatmul.mubr.bf16.gmra.mxu0 %v355_v25  ;;  %v115_v25 = vld [vmem:[%s5015_s0 + $0x290] sm:$0xff] }
  0xb3   :  { %1384 = vmatmul.mubr.bf16.gmra.mxu1 %v357_v26  ;;  %1200 = vmatprep.mubr.bf16.mxu0 %v363_v27  ;;  %v289_v26 = vpack.c.bf16 %v100_v21, %v93_v20  ;;  %v291_v27 = vpack.c.bf16 %v102_v23, %v95_v22  ;;  %v178_v22 = vld [vmem:[%s5015_s0 + $0x488] sm:$0xff]  ;;  %v185_v23 = vld [vmem:[%s5015_s0 + $0x4c0] sm:$0xff] }
  0xb4   :  { %1393 = vmatprep.mubr.bf16.mxu1 %v365_v28  ;;  %v297_v28 = vpack.c.bf16 %v115_v25, %v108_v24  ;;  %v332_v32 = vpack.c.bf16 %v185_v23, %v178_v22 }
  0xba   :  { %1201 = vmatmul.mubr.bf16.gmra.mxu0 %v362_v35  ;;  %v3341_v35 = vld [vmem:[%s5016_s3 + $0x50] sm:$0xff]  }
  0xbb   :  { %1394 = vmatmul.mubr.bf16.gmra.mxu1 %v364_v36  ;;  %1436 = vmatprep.mubr.bf16.mxu0 %v262_v37  ;;  %v3342_v36 = vld [vmem:[%s5016_s3 + $0x10] sm:$0xff]   ;;  %v296_v37 = vpack.c.bf16 %v114_v30, %v107_v29 }
  0xbc   :  { %1629 = vmatprep.mubr.bf16.mxu1 %v3363_v39 }
  0xc2   :  { %1437 = vmatmul.mubr.bf16.vlgmr.msra.gmra.mxu0 %v261_v45  ;;  %v136_v45 = vld [vmem:[%s5015_s0 + $0x338] sm:$0xff] }
  0xc3   :  { %2876 = vmatmul.mubr.msk.bf16.vlgmr.msra.gmra.mxu1 %vm969_vm0, %v263_v46  ;;  %1446 = vmatprep.mubr.bf16.mxu0 %v269_v47  ;;  %v143_v46 = vld [vmem:[%s5015_s0 + $0x370] sm:$0xff]  ;;  %v303_v47 = vpack.c.bf16 %v128_v42, %v121_v41  ;;  %v177_v42 = vld [vmem:[%s5015_s0 + $0x480] sm:$0xff] }
  0xc4   :  { %1639 = vmatprep.mubr.bf16.mxu1 %v3363_v39  ;;  %2928 = vmatpush3.bf16.msra.mxu0 %v3332_v48  ;;  %v305_v48 = vpack.c.bf16 %v130_v44, %v123_v43 }
  0xc5   :  { %2929 = vmatprep.subr.bf16.mxu0 %v3333_v49  ;;  %v311_v49 = vpack.c.bf16 %v143_v46, %v136_v45  ;;  %v184_v45 = vld [vmem:[%s5015_s0 + $0x4b8] sm:$0xff]  ;;  %v179_v46 = vld [vmem:[%s5015_s0 + $0x490] sm:$0xff] }
  0xc8   :  { %2930 = vmatpush3.bf16.msra.mxu0 %v3334_v56  ;;  %v157_v56 = vld [vmem:[%s5015_s0 + $0x3e0] sm:$0xff] }
  0xc9   :  { %2931 = vmatprep.subr.bf16.mxu0 %v3335_v57  ;;  %v3343_v57 = vld [vmem:[%s5016_s3 + $0x48] sm:$0xff]  }
  0xca   :  { %1447 = vmatmul.mubr.bf16.gmra.mxu0 %v268_v58  ;;  %v3344_v58 = vld [vmem:[%s5016_s3 + $0x8] sm:$0xff]  }
  0xcb   :  { %2877 = vmatmul.mubr.msk.bf16.gmra.mxu1 %vm969_vm0, %v270_v59  ;;  %1456 = vmatprep.mubr.bf16.mxu0 %v276_v60  ;;  %v310_v59 = vpack.c.bf16 %v142_v51, %v135_v50  ;;  %v312_v60 = vpack.c.bf16 %v144_v53, %v137_v52  ;;  %v192_v50 = vld [vmem:[%s5015_s0 + $0x4f8] sm:$0xff]  ;;  %v199_v51 = vld [vmem:[%s5015_s0 + $0x530] sm:$0xff] }
  0xcc   :  { %1649 = vmatprep.mubr.bf16.mxu1 %v3363_v39  ;;  %2932 = vmatpush3.bf16.msra.mxu0 %v3336_v61  ;;  %v318_v61 = vpack.c.bf16 %v157_v56, %v150_v55  ;;  %v331_v56 = vpack.c.bf16 %v184_v45, %v177_v42  ;;  %v220_v42 = vld [vmem:[%s5015_s0 + $0x5d8] sm:$0xff] }
  0xcd   :  { %2933 = vmatprep.subr.bf16.mxu0 %v3337_v62  ;;  %v470_v62 = vshrl.u32 %v469_v54, 7 }
  0xcf   :  { %v471_v0 = vsub.s32 0, %v470_v62 }
  0xd0   :  { %2934 = vmatpush3.bf16.msra.mxu0 %v3338_v5  ;;  %v164_v5 = vld [vmem:[%s5015_s0 + $0x418] sm:$0xff] }
  0xd1   :  { %2935 = vmatprep.subr.bf16.mxu0 %v3339_v15  ;;  %v4322_v10 = vrot.slane %v467_v4, %v471_v0  ;;  %v163_v15 = vld [vmem:[%s5015_s0 + $0x410] sm:$0xff] }
  0xd2   :  { %1457 = vmatmul.mubr.bf16.gmra.mxu0 %v275_v6  ;;  %v171_v6 = vld [vmem:[%s5015_s0 + $0x450] sm:$0xff] }
  0xd3   :  { %2878 = vmatmul.mubr.msk.bf16.gmra.mxu1 %vm969_vm0, %v277_v7  ;;  %1466 = vmatprep.mubr.bf16.mxu0 %v283_v8  ;;  %v475_v7 = vsub.s32 1, %v470_v62  ;;  %v317_v8 = vpack.c.bf16 %v156_v1, %v149_v63  ;;  %v325_v11 = vpack.c.bf16 %v171_v6, %v164_v5  ;;  %v198_v6 = vld [vmem:[%s5015_s0 + $0x528] sm:$0xff] }
  0xd4   :  { %1659 = vmatprep.mubr.bf16.mxu1 %v3363_v39  ;;  %2936 = vmatpush3.bf16.msra.mxu0 %v3340_v16 }
  0xd5   :  { %2937 = vmatprep.subr.bf16.mxu0 %v3341_v35  ;;  %v4324_v12 = vrot.slane %v467_v4, %v475_v7  ;;  %v193_v7 = vld [vmem:[%s5015_s0 + $0x500] sm:$0xff] }
  0xd8   :  { %2938 = vmatpush3.bf16.msra.mxu0 %v3342_v36  ;;  %v3346_v36 = vld [vmem:[%s5016_s3] sm:$0xff]  }
  0xd9   :  { %2939 = vmatprep.subr.bf16.mxu0 %v3343_v57 }
  0xda   :  { %1467 = vmatmul.mubr.bf16.gmra.mxu0 %v282_v17  ;;  %v170_v17 = vld [vmem:[%s5015_s0 + $0x448] sm:$0xff] }
  0xdb   :  { %2879 = vmatmul.mubr.msk.bf16.gmra.mxu1 %vm969_vm0, %v284_v18  ;;  %1476 = vmatprep.mubr.bf16.mxu0 %v290_v19  ;;  %v165_v18 = vld [vmem:[%s5015_s0 + $0x420] sm:$0xff]  ;;  %v172_v19 = vld [vmem:[%s5015_s0 + $0x458] sm:$0xff] }
  0xdc   :  { %1669 = vmatprep.mubr.bf16.mxu1 %v3363_v39  ;;  %2940 = vmatpush3.bf16.msra.mxu0 %v3344_v58  ;;  %v326_v29 = vpack.c.bf16 %v172_v19, %v165_v18  ;;  %v338_v19 = vpack.c.bf16 %v198_v6, %v191_v3  ;;  %v221_v3 = vld [vmem:[%s5015_s0 + $0x5e0] sm:$0xff] }
  0xdd   :  { %2941 = vmatprep.subr.bf16.mxu0 %v3345_v33 }
  0xe0   :  { %2942 = vmatpush3.bf16.msra.mxu0 %v3346_v36  ;;  %v207_v36 = vld [vmem:[%s5015_s0 + $0x570] sm:$0xff] }
  0xe2   :  { %1477 = vmatmul.mubr.bf16.gmra.mxu0 %v289_v26 }
  0xe3   :  { %2880 = vmatmul.mubr.msk.bf16.gmra.mxu1 %vm969_vm0, %v291_v27  ;;  %1486 = vmatprep.mubr.bf16.mxu0 %v297_v28  ;;  %v324_v28 = vpack.c.bf16 %v170_v17, %v163_v15 }
  0xe4   :  { %1679 = vmatprep.mubr.bf16.mxu1 %v3363_v39 }
  0xea   :  { %1487 = vmatmul.mubr.bf16.gmra.mxu0 %v296_v37 }
  0xeb   :  { %2881 = vmatmul.mubr.msk.bf16.gmra.mxu1 %vm969_vm0, %v298_v38  ;;  %1496 = vmatprep.mubr.bf16.mxu0 %v304_v40 }
  0xec   :  { %1689 = vmatprep.mubr.bf16.mxu1 %v3363_v39 }
  0xf2   :  { %1497 = vmatmul.mubr.bf16.gmra.mxu0 %v303_v47  ;;  %v186_v47 = vld [vmem:[%s5015_s0 + $0x4c8] sm:$0xff] }
  0xf3   :  { %2882 = vmatmul.mubr.msk.bf16.gmra.mxu1 %vm969_vm0, %v305_v48  ;;  %1506 = vmatprep.mubr.bf16.mxu0 %v311_v49  ;;  %v333_v57 = vpack.c.bf16 %v186_v47, %v179_v46 }
  0xf4   :  { %1699 = vmatprep.mubr.bf16.mxu1 %v3363_v39 }
  0xfa   :  { %1507 = vmatmul.mubr.bf16.gmra.mxu0 %v310_v59 }
  0xfb   :  { %2883 = vmatmul.mubr.msk.bf16.gmra.mxu1 %vm969_vm0, %v312_v60  ;;  %1516 = vmatprep.mubr.bf16.mxu0 %v318_v61  ;;  %v339_v60 = vpack.c.bf16 %v199_v51, %v192_v50 }
  0xfc   :  { %1709 = vmatprep.mubr.bf16.mxu1 %v3363_v39 }
 0x102   :  { %v1052_v13 = vpop.f32.mrf.mxu0  ;;  %1517 = vmatmul.mubr.bf16.gmra.mxu0 %v317_v8  ;;  %v200_v8 = vld [vmem:[%s5015_s0 + $0x538] sm:$0xff] }
 0x103   :  { %v1245_v14 = vpop.f32.mrf.mxu1  ;;  %2884 = vmatmul.mubr.msk.bf16.gmra.mxu1 %vm969_vm0, %v319_v9  ;;  %v1053_v16 = vadd.f32 %v1052_v13, %v4322_v10  ;;  %1526 = vmatprep.mubr.bf16.mxu0 %v325_v11  ;;  %v206_v13 = vld [vmem:[%s5015_s0 + $0x568] sm:$0xff] }
 0x104   :  { %1719 = vmatprep.mubr.bf16.mxu1 %v3363_v39  ;;  %v1054_v20 = vpop.f32.mrf.mxu0 }
 0x105   :  { %v1247_v21 = vpop.f32.mrf.mxu1  ;;  %v4347_v24 = vadd.f32 %v1245_v14, %v1053_v16  ;;  %v1055_v25 = vadd.f32 %v1054_v20, %v4324_v12  ;;  %v213_v14 = vld [vmem:[%s5015_s0 + $0x5a0] sm:$0xff]  ;;  %v340_v20 = vpack.c.bf16 %v200_v8, %v193_v7  ;;  %v234_v8 = vld [vmem:[%s5015_s0 + $0x648] sm:$0xff] }
 0x106   :  { %v1056_v26 = vpop.f32.mrf.mxu0  ;;  %v346_v23 = vpack.c.bf16 %v213_v14, %v206_v13 }
 0x107   :  { %v1249_v27 = vpop.f32.mrf.mxu1  ;;  %v4350_v30 = vadd.f32 %v1247_v21, %v1055_v25  ;;  %v1057_v31 = vadd.f32 %v1056_v26, %v4322_v10 }
 0x108   :  { %v1058_v34 = vpop.f32.mrf.mxu0 }
 0x109   :  { %v1251_v35 = vpop.f32.mrf.mxu1  ;;  %v4359_v37 = vadd.f32 %v1249_v27, %v1057_v31  ;;  %v1059_v38 = vadd.f32 %v1058_v34, %v4324_v12 }
 0x10a   :  { %v1062_v40 = vpop.f32.mrf.mxu0  ;;  %1527 = vmatmul.mubr.bf16.gmra.mxu0 %v324_v28 }
 0x10b   :  { %v1255_v41 = vpop.f32.mrf.mxu1  ;;  %2885 = vmatmul.mubr.msk.bf16.gmra.mxu1 %vm969_vm0, %v326_v29  ;;  %v4366_v43 = vadd.f32 %v1251_v35, %v1059_v38  ;;  %v1063_v44 = vadd.f32 %v1062_v40, %v4322_v10  ;;  %1536 = vmatprep.mubr.bf16.mxu0 %v332_v32  ;;  %v205_v32 = vld [vmem:[%s5015_s0 + $0x560] sm:$0xff]  ;;  %v212_v35 = vld [vmem:[%s5015_s0 + $0x598] sm:$0xff]  ;;  %v214_v38 = vld [vmem:[%s5015_s0 + $0x5a8] sm:$0xff] }
 0x10c   :  { %1729 = vmatprep.mubr.bf16.mxu1 %v3363_v39  ;;  %v1064_v48 = vpop.f32.mrf.mxu0  ;;  %v347_v50 = vpack.c.bf16 %v214_v38, %v207_v36  ;;  %v242_v36 = vld [vmem:[%s5015_s0 + $0x688] sm:$0xff] }
 0x10d   :  { %v1257_v49 = vpop.f32.mrf.mxu1  ;;  %v4385_v52 = vadd.f32 %v1255_v41, %v1063_v44  ;;  %v1065_v53 = vadd.f32 %v1064_v48, %v4324_v12  ;;  %v227_v44 = vld [vmem:[%s5015_s0 + $0x610] sm:$0xff] }
 0x10e   :  { %v1066_v54 = vpop.f32.mrf.mxu0 }
 0x10f   :  { %v1259_v55 = vpop.f32.mrf.mxu1  ;;  %v4388_v58 = vadd.f32 %v1257_v49, %v1065_v53  ;;  %v1067_v59 = vadd.f32 %v1066_v54, %v4322_v10  ;;  %v345_v49 = vpack.c.bf16 %v212_v35, %v205_v32  ;;  %v353_v54 = vpack.c.bf16 %v227_v44, %v220_v42  ;;  %v235_v35 = vld [vmem:[%s5015_s0 + $0x650] sm:$0xff] }
 0x110   :  { %v1068_v61 = vpop.f32.mrf.mxu0  ;;  %v255_v42 = vld [vmem:[%s5015_s0 + $0x6f0] sm:$0xff] }
 0x111   :  { %v1261_v62 = vpop.f32.mrf.mxu1  ;;  %v4391_v63 = vadd.f32 %v1259_v55, %v1067_v59  ;;  %v1069_v0 = vadd.f32 %v1068_v61, %v4324_v12 }
 0x112   :  { %v1072_v1 = vpop.f32.mrf.mxu0  ;;  %1537 = vmatmul.mubr.bf16.gmra.mxu0 %v331_v56 }
 0x113   :  { %v1265_v2 = vpop.f32.mrf.mxu1  ;;  %2886 = vmatmul.mubr.msk.bf16.gmra.mxu1 %vm969_vm0, %v333_v57  ;;  %v4398_v4 = vadd.f32 %v1261_v62, %v1069_v0  ;;  %v1073_v5 = vadd.f32 %v1072_v1, %v4322_v10  ;;  %1546 = vmatprep.mubr.bf16.mxu0 %v339_v60  ;;  %v219_v62 = vld [vmem:[%s5015_s0 + $0x5d0] sm:$0xff] }
 0x114   :  { %1739 = vmatprep.mubr.bf16.mxu1 %v3363_v39  ;;  %v1074_v9 = vpop.f32.mrf.mxu0 }
 0x115   :  { %v1267_v11 = vpop.f32.mrf.mxu1  ;;  %v4417_v15 = vadd.f32 %v1265_v2, %v1073_v5  ;;  %v1075_v16 = vadd.f32 %v1074_v9, %v4324_v12  ;;  %v226_v2 = vld [vmem:[%s5015_s0 + $0x608] sm:$0xff]  ;;  %v228_v5 = vld [vmem:[%s5015_s0 + $0x618] sm:$0xff]  ;;  %v241_v9 = vld [vmem:[%s5015_s0 + $0x680] sm:$0xff] }
 0x116   :  { %v1076_v17 = vpop.f32.mrf.mxu0 }
 0x117   :  { %v1269_v18 = vpop.f32.mrf.mxu1  ;;  %v4420_v21 = vadd.f32 %v1267_v11, %v1075_v16  ;;  %v1077_v22 = vadd.f32 %v1076_v17, %v4322_v10  ;;  %v352_v17 = vpack.c.bf16 %v226_v2, %v219_v62 }
 0x118   :  { %v1078_v25 = vpop.f32.mrf.mxu0 }
 0x119   :  { %v1271_v26 = vpop.f32.mrf.mxu1  ;;  %v4423_v27 = vadd.f32 %v1269_v18, %v1077_v22  ;;  %v1079_v28 = vadd.f32 %v1078_v25, %v4324_v12  ;;  %v354_v18 = vpack.c.bf16 %v228_v5, %v221_v3  ;;  %v360_v22 = vpack.c.bf16 %v241_v9, %v234_v8  ;;  %v254_v3 = vld [vmem:[%s5015_s0 + $0x6e8] sm:$0xff]  ;;  %v249_v5 = vld [vmem:[%s5015_s0 + $0x6c0] sm:$0xff] }
 0x11a   :  { %v1082_v29 = vpop.f32.mrf.mxu0  ;;  %1547 = vmatmul.mubr.bf16.gmra.mxu0 %v338_v19 }
 0x11b   :  { %v1275_v31 = vpop.f32.mrf.mxu1  ;;  %2887 = vmatmul.mubr.msk.bf16.gmra.mxu1 %vm969_vm0, %v340_v20  ;;  %v4430_v33 = vadd.f32 %v1271_v26, %v1079_v28  ;;  %v1083_v34 = vadd.f32 %v1082_v29, %v4322_v10  ;;  %1556 = vmatprep.mubr.bf16.mxu0 %v346_v23 }
 0x11c   :  { %1749 = vmatprep.mubr.bf16.mxu1 %v3363_v39  ;;  %v1084_v40 = vpop.f32.mrf.mxu0 }
 0x11d   :  { %v1277_v41 = vpop.f32.mrf.mxu1  ;;  %v4449_v45 = vadd.f32 %v1275_v31, %v1083_v34  ;;  %v1085_v46 = vadd.f32 %v1084_v40, %v4324_v12  ;;  %v233_v31 = vld [vmem:[%s5015_s0 + $0x640] sm:$0xff]  ;;  %v240_v34 = vld [vmem:[%s5015_s0 + $0x678] sm:$0xff] }
 0x11e   :  { %v1086_v47 = vpop.f32.mrf.mxu0 }
 0x11f   :  { %v1279_v48 = vpop.f32.mrf.mxu1  ;;  %v4452_v51 = vadd.f32 %v1277_v41, %v1085_v46  ;;  %v1087_v53 = vadd.f32 %v1086_v47, %v4322_v10  ;;  %v248_v41 = vld [vmem:[%s5015_s0 + $0x6b8] sm:$0xff] }
 0x120   :  { %v1088_v55 = vpop.f32.mrf.mxu0 }
 0x121   :  { %v1281_v56 = vpop.f32.mrf.mxu1  ;;  %v4455_v57 = vadd.f32 %v1279_v48, %v1087_v53  ;;  %v1089_v59 = vadd.f32 %v1088_v55, %v4324_v12  ;;  %v367_v55 = vpack.c.bf16 %v255_v42, %v248_v41 }
 0x122   :  { %v1092_v60 = vpop.f32.mrf.mxu0  ;;  %1557 = vmatmul.mubr.bf16.gmra.mxu0 %v345_v49  ;;  %v359_v49 = vpack.c.bf16 %v240_v34, %v233_v31 }
 0x123   :  { %v1285_v61 = vpop.f32.mrf.mxu1  ;;  %2888 = vmatmul.mubr.msk.bf16.gmra.mxu1 %vm969_vm0, %v347_v50  ;;  %v4462_v0 = vadd.f32 %v1281_v56, %v1089_v59  ;;  %v1093_v1 = vadd.f32 %v1092_v60, %v4322_v10  ;;  %1566 = vmatprep.mubr.bf16.mxu0 %v353_v54  ;;  %v361_v50 = vpack.c.bf16 %v242_v36, %v235_v35 }
 0x124   :  { %1759 = vmatprep.mubr.bf16.mxu1 %v3363_v39  ;;  %v1094_v6 = vpop.f32.mrf.mxu0 }
 0x125   :  { %v1287_v7 = vpop.f32.mrf.mxu1  ;;  %v4481_v11 = vadd.f32 %v1285_v61, %v1093_v1  ;;  %v1095_v13 = vadd.f32 %v1094_v6, %v4324_v12  ;;  %v247_v1 = vld [vmem:[%s5015_s0 + $0x6b0] sm:$0xff]  ;;  %v256_v6 = vld [vmem:[%s5015_s0 + $0x6f8] sm:$0xff] }
 0x126   :  { %v1096_v14 = vpop.f32.mrf.mxu0 }
 0x127   :  { %v1289_v16 = vpop.f32.mrf.mxu1  ;;  %v4484_v19 = vadd.f32 %v1287_v7, %v1095_v13  ;;  %v1097_v20 = vadd.f32 %v1096_v14, %v4322_v10 }
 0x128   :  { %v4487_v23 = vpop.f32.mrf.mxu0 }
 0x129   :  { %v4489_v25 = vpop.f32.mrf.mxu1  ;;  %v4491_v26 = vadd.f32 %v1289_v16, %v1097_v20  ;;  %v366_v16 = vpack.c.bf16 %v254_v3, %v247_v1 }
 0x12a   :  { %v1102_v28 = vpop.f32.mrf.mxu0  ;;  %1567 = vmatmul.mubr.bf16.gmra.mxu0 %v352_v17  ;;  %v368_v17 = vpack.c.bf16 %v256_v6, %v249_v5 }
 0x12b   :  { %v1295_v29 = vpop.f32.mrf.mxu1  ;;  %2889 = vmatmul.mubr.msk.bf16.gmra.mxu1 %vm969_vm0, %v354_v18  ;;  %v1103_v32 = vadd.f32 %v1102_v28, %v4322_v10  ;;  %1576 = vmatprep.mubr.bf16.mxu0 %v360_v22 }
 0x12c   :  { %1769 = vmatprep.mubr.bf16.mxu1 %v3363_v39  ;;  %v1104_v38 = vpop.f32.mrf.mxu0 }
 0x12d   :  { %v1297_v40 = vpop.f32.mrf.mxu1  ;;  %v4514_v44 = vadd.f32 %v1295_v29, %v1103_v32  ;;  %v1105_v46 = vadd.f32 %v1104_v38, %v4324_v12 }
 0x12e   :  { %v1106_v47 = vpop.f32.mrf.mxu0 }
 0x12f   :  { %v1299_v48 = vpop.f32.mrf.mxu1  ;;  %v4517_v53 = vadd.f32 %v1297_v40, %v1105_v46  ;;  %v1107_v54 = vadd.f32 %v1106_v47, %v4322_v10 }
 0x130   :  { %v4520_v56 = vpop.f32.mrf.mxu0 }
 0x131   :  { %v4522_v59 = vpop.f32.mrf.mxu1  ;;  %v4524_v60 = vadd.f32 %v1299_v48, %v1107_v54 }
 0x132   :  { %v1112_v61 = vpop.f32.mrf.mxu0  ;;  %1577 = vmatmul.mubr.bf16.gmra.mxu0 %v359_v49 }
 0x133   :  { %v1305_v62 = vpop.f32.mrf.mxu1  ;;  %2890 = vmatmul.mubr.msk.bf16.gmra.mxu1 %vm969_vm0, %v361_v50  ;;  %v1113_v2 = vadd.f32 %v1112_v61, %v4322_v10  ;;  %1586 = vmatprep.mubr.bf16.mxu0 %v367_v55 }
 0x134   :  { %1779 = vmatprep.mubr.bf16.mxu1 %v3363_v39  ;;  %v1114_v7 = vpop.f32.mrf.mxu0 }
 0x135   :  { %v1307_v8 = vpop.f32.mrf.mxu1  ;;  %v4541_v9 = vadd.f32 %v1305_v62, %v1113_v2  ;;  %v1115_v13 = vadd.f32 %v1114_v7, %v4324_v12 }
 0x136   :  { %v1116_v14 = vpop.f32.mrf.mxu0 }
 0x137   :  { %v1309_v39 = vpop.f32.mrf.mxu1  ;;  %v4544_v18 = vadd.f32 %v1307_v8, %v1115_v13  ;;  %v1117_v20 = vadd.f32 %v1116_v14, %v4322_v10 }
 0x138   :  { %v4547_v22 = vpop.f32.mrf.mxu0 }
 0x139   :  { %v4549_v28 = vpop.f32.mrf.mxu1  ;;  %v4551_v29 = vadd.f32 %v1309_v39, %v1117_v20 }
 0x13a   :  { %v1122_v31 = vpop.f32.mrf.mxu0  ;;  %1587 = vmatmul.mubr.bf16.gmra.mxu0 %v366_v16 }
 0x13b   :  { %v1315_v32 = vpop.f32.mrf.mxu1  ;;  %2891 = vmatmul.mubr.msk.bf16.gmra.mxu1 %vm969_vm0, %v368_v17  ;;  %v1123_v34 = vadd.f32 %v1122_v31, %v4322_v10 }
 0x13c   :  { %v1124_v35 = vpop.f32.mrf.mxu0 }
 0x13d   :  { %v1317_v36 = vpop.f32.mrf.mxu1  ;;  %v4555_v38 = vadd.f32 %v1315_v32, %v1123_v34  ;;  %v1125_v40 = vadd.f32 %v1124_v35, %v4324_v12 }
 0x13e   :  { %v1126_v41 = vpop.f32.mrf.mxu0 }
 0x13f   :  { %v1319_v42 = vpop.f32.mrf.mxu1  ;;  %v4558_v46 = vadd.f32 %v1317_v36, %v1125_v40  ;;  %v1127_v47 = vadd.f32 %v1126_v41, %v4322_v10 }
 0x140   :  { %v4561_v48 = vpop.f32.mrf.mxu0 }
 0x141   :  { %v4563_v49 = vpop.f32.mrf.mxu1  ;;  %v4565_v50 = vadd.f32 %v1319_v42, %v1127_v47 }
 0x142   :  { %v1132_v54 = vpop.f32.mrf.mxu0 }
 0x143   :  { %v1325_v55 = vpop.f32.mrf.mxu1  ;;  %v1133_v61 = vadd.f32 %v1132_v54, %v4322_v10 }
 0x144   :  { %v1134_v62 = vpop.f32.mrf.mxu0 }
 0x145   :  { %v1327_v1 = vpop.f32.mrf.mxu1  ;;  %v4568_v2 = vadd.f32 %v1325_v55, %v1133_v61  ;;  %v1135_v3 = vadd.f32 %v1134_v62, %v4324_v12 }
 0x146   :  { %v1136_v5 = vpop.f32.mrf.mxu0 }
 0x147   :  { %v1329_v6 = vpop.f32.mrf.mxu1  ;;  %v4571_v7 = vadd.f32 %v1327_v1, %v1135_v3  ;;  %v1137_v8 = vadd.f32 %v1136_v5, %v4322_v10 }
 0x148   :  { %v4574_v13 = vpop.f32.mrf.mxu0 }
 0x149   :  { %v4576_v14 = vpop.f32.mrf.mxu1  ;;  %v4578_v39 = vadd.f32 %v1329_v6, %v1137_v8 }
 0x14a   :  { %v1142_v16 = vpop.f32.mrf.mxu0 }
 0x14b   :  { %v1335_v17 = vpop.f32.mrf.mxu1  ;;  %v1143_v20 = vadd.f32 %v1142_v16, %v4322_v10 }
 0x14c   :  { %v1144_v31 = vpop.f32.mrf.mxu0 }
 0x14d   :  { %v1337_v32 = vpop.f32.mrf.mxu1  ;;  %v4581_v34 = vadd.f32 %v1335_v17, %v1143_v20  ;;  %v1145_v35 = vadd.f32 %v1144_v31, %v4324_v12 }
 0x14e   :  { %v1146_v36 = vpop.f32.mrf.mxu0 }
 0x14f   :  { %v1339_v40 = vpop.f32.mrf.mxu1  ;;  %v4584_v41 = vadd.f32 %v1337_v32, %v1145_v35  ;;  %v1147_v42 = vadd.f32 %v1146_v36, %v4322_v10 }
 0x150   :  { %v4587_v47 = vpop.f32.mrf.mxu0 }
 0x151   :  { %v4589_v54 = vpop.f32.mrf.mxu1  ;;  %v4591_v55 = vadd.f32 %v1339_v40, %v1147_v42 }
 0x152   :  { %5024 = vst [vmem:[#allocation2_spill] sm:$0xff] %v4589_v54  ;;  %v1152_v61 = vpop.f32.mrf.mxu0 }
 0x153   :  { %5025 = vst [vmem:[#allocation3_spill] sm:$0xff] %v4591_v55  ;;  %v1345_v62 = vpop.f32.mrf.mxu1  ;;  %v1153_v1 = vadd.f32 %v1152_v61, %v4322_v10 }
 0x154   :  { %v1154_v3 = vpop.f32.mrf.mxu0 }
 0x155   :  { %v1347_v5 = vpop.f32.mrf.mxu1  ;;  %v4594_v6 = vadd.f32 %v1345_v62, %v1153_v1  ;;  %v1155_v8 = vadd.f32 %v1154_v3, %v4324_v12 }
 0x156   :  { %v1156_v16 = vpop.f32.mrf.mxu0 }
 0x157   :  { %5026 = vst [vmem:[#allocation4_spill] sm:$0xff] %v4594_v6  ;;  %v1349_v17 = vpop.f32.mrf.mxu1  ;;  %v4597_v20 = vadd.f32 %v1347_v5, %v1155_v8  ;;  %v1157_v31 = vadd.f32 %v1156_v16, %v4322_v10 }
 0x158   :  { %v4600_v32 = vpop.f32.mrf.mxu0 }
 0x159   :  { %5027 = vst [vmem:[#allocation5_spill] sm:$0xff] %v4597_v20  ;;  %5028 = vst [vmem:[#allocation6_spill] sm:$0xff] %v4600_v32  ;;  %v4602_v35 = vpop.f32.mrf.mxu1  ;;  %v4604_v36 = vadd.f32 %v1349_v17, %v1157_v31 }
 0x15a   :  { %5029 = vst [vmem:[#allocation7_spill] sm:$0xff] %v4602_v35  ;;  %v1162_v40 = vpop.f32.mrf.mxu0 }
 0x15b   :  { %5030 = vst [vmem:[#allocation8_spill] sm:$0xff] %v4604_v36  ;;  %v1355_v42 = vpop.f32.mrf.mxu1  ;;  %v1163_v61 = vadd.f32 %v1162_v40, %v4322_v10 }
 0x15c   :  { %v1164_v62 = vpop.f32.mrf.mxu0 }
 0x15d   :  { %v1357_v1 = vpop.f32.mrf.mxu1  ;;  %v4607_v6 = vadd.f32 %v1355_v42, %v1163_v61  ;;  %v1165_v3 = vadd.f32 %v1164_v62, %v4324_v12 }
 0x15e   :  { %v1166_v5 = vpop.f32.mrf.mxu0 }
 0x15f   :  { %5031 = vst [vmem:[#allocation9_spill] sm:$0xff] %v4607_v6  ;;  %v1359_v8 = vpop.f32.mrf.mxu1  ;;  %v4610_v20 = vadd.f32 %v1357_v1, %v1165_v3  ;;  %v1167_v16 = vadd.f32 %v1166_v5, %v4322_v10 }
 0x160   :  { %v4613_v32 = vpop.f32.mrf.mxu0 }
 0x161   :  { %5032 = vst [vmem:[#allocation10_spill] sm:$0xff] %v4610_v20  ;;  %5033 = vst [vmem:[#allocation11_spill] sm:$0xff] %v4613_v32  ;;  %v4615_v17 = vpop.f32.mrf.mxu1  ;;  %v4617_v31 = vadd.f32 %v1359_v8, %v1167_v16 }
 0x162   :  { %5034 = vst [vmem:[#allocation12_spill] sm:$0xff] %v4615_v17  ;;  %v1172_v36 = vpop.f32.mrf.mxu0 }
 0x163   :  { %5035 = vst [vmem:[#allocation13_spill] sm:$0xff] %v4617_v31  ;;  %v1365_v40 = vpop.f32.mrf.mxu1  ;;  %v1173_v35 = vadd.f32 %v1172_v36, %v4322_v10 }
 0x164   :  { %v1174_v42 = vpop.f32.mrf.mxu0 }
 0x165   :  { %v1367_v61 = vpop.f32.mrf.mxu1  ;;  %v4620_v6 = vadd.f32 %v1365_v40, %v1173_v35  ;;  %v1175_v62 = vadd.f32 %v1174_v42, %v4324_v12 }
 0x166   :  { %v1176_v1 = vpop.f32.mrf.mxu0 }
 0x167   :  { %5036 = vst [vmem:[#allocation14_spill] sm:$0xff] %v4620_v6  ;;  %v1369_v3 = vpop.f32.mrf.mxu1  ;;  %v4623_v20 = vadd.f32 %v1367_v61, %v1175_v62  ;;  %v1177_v5 = vadd.f32 %v1176_v1, %v4322_v10 }
 0x168   :  { %v4626_v32 = vpop.f32.mrf.mxu0 }
 0x169   :  { %5037 = vst [vmem:[#allocation15_spill] sm:$0xff] %v4623_v20  ;;  %5038 = vst [vmem:[#allocation16_spill] sm:$0xff] %v4626_v32  ;;  %v4628_v8 = vpop.f32.mrf.mxu1  ;;  %v4630_v16 = vadd.f32 %v1369_v3, %v1177_v5 }
 0x16a   :  { %5039 = vst [vmem:[#allocation17_spill] sm:$0xff] %v4628_v8  ;;  %v1182_v31 = vpop.f32.mrf.mxu0 }
 0x16b   :  { %5040 = vst [vmem:[#allocation18_spill] sm:$0xff] %v4630_v16  ;;  %v1375_v36 = vpop.f32.mrf.mxu1  ;;  %v1183_v17 = vadd.f32 %v1182_v31, %v4322_v10 }
 0x16c   :  { %v1184_v35 = vpop.f32.mrf.mxu0 }
 0x16d   :  { %v1377_v40 = vpop.f32.mrf.mxu1  ;;  %v4633_v6 = vadd.f32 %v1375_v36, %v1183_v17  ;;  %v1185_v42 = vadd.f32 %v1184_v35, %v4324_v12 }
 0x16e   :  { %v1186_v61 = vpop.f32.mrf.mxu0 }
 0x16f   :  { %5041 = vst [vmem:[#allocation19_spill] sm:$0xff] %v4633_v6  ;;  %v1379_v62 = vpop.f32.mrf.mxu1  ;;  %v4636_v20 = vadd.f32 %v1377_v40, %v1185_v42  ;;  %v1187_v1 = vadd.f32 %v1186_v61, %v4322_v10 }
 0x170   :  { %v4639_v32 = vpop.f32.mrf.mxu0 }
 0x171   :  { %5042 = vst [vmem:[#allocation20_spill] sm:$0xff] %v4636_v20  ;;  %5043 = vst [vmem:[#allocation21_spill] sm:$0xff] %v4639_v32  ;;  %v4641_v3 = vpop.f32.mrf.mxu1  ;;  %v4643_v5 = vadd.f32 %v1379_v62, %v1187_v1 }
 0x172   :  { %5044 = vst [vmem:[#allocation22_spill] sm:$0xff] %v4641_v3  ;;  %v1192_v16 = vpop.f32.mrf.mxu0 }
 0x173   :  { %5045 = vst [vmem:[#allocation23_spill] sm:$0xff] %v4643_v5  ;;  %v1385_v31 = vpop.f32.mrf.mxu1  ;;  %v1193_v8 = vadd.f32 %v1192_v16, %v4322_v10 }
 0x174   :  { %v1194_v17 = vpop.f32.mrf.mxu0 }
 0x175   :  { %v1387_v36 = vpop.f32.mrf.mxu1  ;;  %v4646_v6 = vadd.f32 %v1385_v31, %v1193_v8  ;;  %v1195_v35 = vadd.f32 %v1194_v17, %v4324_v12 }
 0x176   :  { %v1196_v40 = vpop.f32.mrf.mxu0 }
 0x177   :  { %5046 = vst [vmem:[#allocation24_spill] sm:$0xff] %v4646_v6  ;;  %v1389_v42 = vpop.f32.mrf.mxu1  ;;  %v4649_v20 = vadd.f32 %v1387_v36, %v1195_v35  ;;  %v1197_v61 = vadd.f32 %v1196_v40, %v4322_v10 }
 0x178   :  { %v4652_v32 = vpop.f32.mrf.mxu0 }
 0x179   :  { %5047 = vst [vmem:[#allocation25_spill] sm:$0xff] %v4649_v20  ;;  %5048 = vst [vmem:[#allocation26_spill] sm:$0xff] %v4652_v32  ;;  %v4654_v62 = vpop.f32.mrf.mxu1  ;;  %v4656_v1 = vadd.f32 %v1389_v42, %v1197_v61 }
 0x17a   :  { %5049 = vst [vmem:[#allocation27_spill] sm:$0xff] %v4654_v62  ;;  %v1202_v5 = vpop.f32.mrf.mxu0 }
 0x17b   :  { %5050 = vst [vmem:[#allocation28_spill] sm:$0xff] %v4656_v1  ;;  %v1395_v16 = vpop.f32.mrf.mxu1  ;;  %v1203_v3 = vadd.f32 %v1202_v5, %v4322_v10 }
 0x17c   :  { %v1204_v8 = vpop.f32.mrf.mxu0 }
 0x17d   :  { %v1397_v31 = vpop.f32.mrf.mxu1  ;;  %v4659_v6 = vadd.f32 %v1395_v16, %v1203_v3  ;;  %v1205_v17 = vadd.f32 %v1204_v8, %v4324_v12 }
 0x17e   :  { %v1206_v36 = vpop.f32.mrf.mxu0 }
 0x17f   :  { %5051 = vst [vmem:[#allocation29_spill] sm:$0xff] %v4659_v6  ;;  %v1399_v35 = vpop.f32.mrf.mxu1  ;;  %v4662_v20 = vadd.f32 %v1397_v31, %v1205_v17  ;;  %v1207_v40 = vadd.f32 %v1206_v36, %v4322_v10 }
 0x180   :  { %v4665_v32 = vpop.f32.mrf.mxu0 }
 0x181   :  { %5052 = vst [vmem:[#allocation30_spill] sm:$0xff] %v4662_v20  ;;  %5053 = vst [vmem:[#allocation31_spill] sm:$0xff] %v4665_v32  ;;  %v4667_v42 = vpop.f32.mrf.mxu1  ;;  %v4669_v61 = vadd.f32 %v1399_v35, %v1207_v40 }
 0x182   :  { %5054 = vst [vmem:[#allocation32_spill] sm:$0xff] %v4667_v42  ;;  %v1438_v1 = vpop.f32.mrf.mxu0 }
 0x183   :  { %5055 = vst [vmem:[#allocation33_spill] sm:$0xff] %v4669_v61  ;;  %v1631_v5 = vpop.f32.mrf.mxu1  ;;  %v1439_v62 = vadd.f32 %v1438_v1, %v4347_v24 }
 0x184   :  { %v1440_v3 = vpop.f32.mrf.mxu0 }
 0x185   :  { %v1633_v16 = vpop.f32.mrf.mxu1  ;;  %v1441_v8 = vadd.f32 %v1440_v3, %v4350_v30  ;;  %v1632_v6 = vadd.f32 %v1631_v5, %v1439_v62  ;;  %v3347_v30 = vld [vmem:[%s5018_s5 + $0x38] sm:$0xff]  }
 0x186   :  { %v1442_v55 = vpop.f32.mrf.mxu0  ;;  %3087 = vmatprep.subr.bf16.mxu1 %v3347_v30 }
 0x187   :  { %v1635_v31 = vpop.f32.mrf.mxu1  ;;  %v1443_v17 = vadd.f32 %v1442_v55, %v4359_v37  ;;  %v1634_v20 = vadd.f32 %v1633_v16, %v1441_v8  ;;  %v1790_v40 = vmax.f32 %v1632_v6, 0.0  ;;  %v3348_v37 = vld [vmem:[%s5018_s5 + $0x30] sm:$0xff]   ;;  %3088 = vmatpush3.bf16.msra.mxu1 %v3347_v30 }
 0x188   :  { %v1444_v10 = vpop.f32.mrf.mxu0  ;;  %3089 = vmatprep.subr.bf16.mxu1 %v3348_v37 }
 0x189   :  { %v1637_v36 = vpop.f32.mrf.mxu1  ;;  %v1636_v32 = vadd.f32 %v1635_v31, %v1443_v17  ;;  %v1445_v35 = vadd.f32 %v1444_v10, %v4366_v43  ;;  %v1791_v55 = vmax.f32 %v1634_v20, 0.0  ;;  %v3349_v31 = vld [vmem:[%s5018_s5 + $0x28] sm:$0xff]  }
 0x18a   :  { %v1448_v61 = vpop.f32.mrf.mxu0 }
 0x18b   :  { %v1641_v42 = vpop.f32.mrf.mxu1  ;;  %v1792_v54 = vmax.f32 %v1636_v32, 0.0  ;;  %v1638_v24 = vadd.f32 %v1637_v36, %v1445_v35  ;;  %v1449_v1 = vadd.f32 %v1448_v61, %v4385_v52  ;;  %3090 = vmatpush3.bf16.msra.mxu1 %v3348_v37 }
 0x18c   :  { %v1450_v62 = vpop.f32.mrf.mxu0  ;;  %3091 = vmatprep.subr.bf16.mxu1 %v3349_v31 }
 0x18d   :  { %v1643_v5 = vpop.f32.mrf.mxu1  ;;  %v1854_v3 = vpack.c.bf16 %v1792_v54, %v1790_v40  ;;  %v1793_v43 = vmax.f32 %v1638_v24, 0.0  ;;  %v1451_v6 = vadd.f32 %v1450_v62, %v4388_v58  ;;  %v1642_v52 = vadd.f32 %v1641_v42, %v1449_v1  ;;  %v3350_v1 = vld [vmem:[%s5018_s5 + $0x20] sm:$0xff]  }
 0x18e   :  { %v1452_v32 = vpop.f32.mrf.mxu0 }
 0x18f   :  { %v1645_v16 = vpop.f32.mrf.mxu1  ;;  %v1453_v61 = vadd.f32 %v1452_v32, %v4391_v63  ;;  %v1855_v8 = vpack.c.bf16 %v1793_v43, %v1791_v55  ;;  %v1644_v20 = vadd.f32 %v1643_v5, %v1451_v6  ;;  %v1794_v42 = vmax.f32 %v1642_v52, 0.0  ;;  %3092 = vmatpush3.bf16.msra.mxu1 %v3349_v31 }
 0x190   :  { %v1454_v17 = vpop.f32.mrf.mxu0  ;;  %3093 = vmatprep.subr.bf16.mxu1 %v3350_v1 }
 0x191   :  { %v1647_v10 = vpop.f32.mrf.mxu1  ;;  %v1646_v54 = vadd.f32 %v1645_v16, %v1453_v61  ;;  %v1455_v36 = vadd.f32 %v1454_v17, %v4398_v4  ;;  %2053 = vmatprep.mubr.bf16.mxu0 %v1855_v8  ;;  %v1795_v5 = vmax.f32 %v1644_v20, 0.0 }
 0x192   :  { %v1458_v58 = vpop.f32.mrf.mxu0  ;;  %2054 = vmatmul.mubr.bf16.vlgmr.msra.gmra.mxu0 %v1854_v3 }
 0x193   :  { %v1651_v35 = vpop.f32.mrf.mxu1  ;;  %v1796_v40 = vmax.f32 %v1646_v54, 0.0  ;;  %v1648_v63 = vadd.f32 %v1647_v10, %v1455_v36  ;;  %v1459_v24 = vadd.f32 %v1458_v58, %v4417_v15  ;;  %3094 = vmatpush3.bf16.msra.mxu1 %v3350_v1 }
 0x194   :  { %v1460_v30 = vpop.f32.mrf.mxu0 }
 0x195   :  { %v1653_v62 = vpop.f32.mrf.mxu1  ;;  %v1856_v55 = vpack.c.bf16 %v1796_v40, %v1794_v42  ;;  %v1797_v4 = vmax.f32 %v1648_v63, 0.0  ;;  %v1461_v43 = vadd.f32 %v1460_v30, %v4420_v21  ;;  %v1652_v37 = vadd.f32 %v1651_v35, %v1459_v24 }
 0x196   :  { %v1462_v6 = vpop.f32.mrf.mxu0 }
 0x197   :  { %v1655_v3 = vpop.f32.mrf.mxu1  ;;  %v1463_v32 = vadd.f32 %v1462_v6, %v4423_v27  ;;  %v1857_v16 = vpack.c.bf16 %v1797_v4, %v1795_v5  ;;  %v1654_v61 = vadd.f32 %v1653_v62, %v1461_v43  ;;  %v1798_v21 = vmax.f32 %v1652_v37, 0.0 }
 0x198   :  { %v1464_v15 = vpop.f32.mrf.mxu0 }
 0x199   :  { %v1657_v52 = vpop.f32.mrf.mxu1  ;;  %v1656_v8 = vadd.f32 %v1655_v3, %v1463_v32  ;;  %v1465_v17 = vadd.f32 %v1464_v15, %v4430_v33  ;;  %2061 = vmatprep.mubr.bf16.mxu0 %v1857_v16  ;;  %v1799_v35 = vmax.f32 %v1654_v61, 0.0 }
 0x19a   :  { %v1468_v10 = vpop.f32.mrf.mxu0  ;;  %2062 = vmatmul.mubr.bf16.gmra.mxu0 %v1856_v55 }
 0x19b   :  { %v1661_v20 = vpop.f32.mrf.mxu1  ;;  %v1800_v54 = vmax.f32 %v1656_v8, 0.0  ;;  %v1658_v36 = vadd.f32 %v1657_v52, %v1465_v17  ;;  %v1469_v31 = vadd.f32 %v1468_v10, %v4449_v45  ;;  %v1099_v45 = vadd.f32 %v4487_v23, %v4324_v12 }
 0x19c   :  { %v1470_v58 = vpop.f32.mrf.mxu0 }
 0x19d   :  { %v1663_v27 = vpop.f32.mrf.mxu1  ;;  %v1858_v42 = vpack.c.bf16 %v1800_v54, %v1798_v21  ;;  %v1801_v40 = vmax.f32 %v1658_v36, 0.0  ;;  %v1471_v63 = vadd.f32 %v1470_v58, %v4452_v51  ;;  %v1662_v33 = vadd.f32 %v1661_v20, %v1469_v31 }
 0x19e   :  { %v1472_v24 = vpop.f32.mrf.mxu0  ;;  %v1292_v21 = vadd.f32 %v4489_v25, %v1099_v45 }
 0x19f   :  { %v1665_v30 = vpop.f32.mrf.mxu1  ;;  %v1473_v62 = vadd.f32 %v1472_v24, %v4455_v57  ;;  %v1859_v5 = vpack.c.bf16 %v1801_v40, %v1799_v35  ;;  %v1664_v4 = vadd.f32 %v1663_v27, %v1471_v63  ;;  %v1802_v51 = vmax.f32 %v1662_v33, 0.0 }
 0x1a0   :  { %v1474_v55 = vpop.f32.mrf.mxu0 }
 0x1a1   :  { %v1667_v1 = vpop.f32.mrf.mxu1  ;;  %v1666_v43 = vadd.f32 %v1665_v30, %v1473_v62  ;;  %v1475_v6 = vadd.f32 %v1474_v55, %v4462_v0  ;;  %2069 = vmatprep.mubr.bf16.mxu0 %v1859_v5  ;;  %v1803_v61 = vmax.f32 %v1664_v4, 0.0 }
 0x1a2   :  { %v1478_v3 = vpop.f32.mrf.mxu0  ;;  %2070 = vmatmul.mubr.bf16.gmra.mxu0 %v1858_v42  ;;  %v1109_v42 = vadd.f32 %v4520_v56, %v4324_v12 }
 0x1a3   :  { %v1671_v37 = vpop.f32.mrf.mxu1  ;;  %v1804_v32 = vmax.f32 %v1666_v43, 0.0  ;;  %v1668_v16 = vadd.f32 %v1667_v1, %v1475_v6  ;;  %v1479_v15 = vadd.f32 %v1478_v3, %v4481_v11 }
 0x1a4   :  { %v1480_v57 = vpop.f32.mrf.mxu0  ;;  %v1302_v6 = vadd.f32 %v4522_v59, %v1109_v42 }
 0x1a5   :  { %v1673_v52 = vpop.f32.mrf.mxu1  ;;  %v1860_v8 = vpack.c.bf16 %v1804_v32, %v1802_v51  ;;  %v1805_v17 = vmax.f32 %v1668_v16, 0.0  ;;  %v1481_v10 = vadd.f32 %v1480_v57, %v4484_v19  ;;  %v1672_v23 = vadd.f32 %v1671_v37, %v1479_v15 }
 0x1a6   :  { %v1482_v0 = vpop.f32.mrf.mxu0  ;;  %v1119_v15 = vadd.f32 %v4547_v22, %v4324_v12 }
 0x1a7   :  { %v1675_v20 = vpop.f32.mrf.mxu1  ;;  %v1483_v54 = vadd.f32 %v1482_v0, %v4491_v26  ;;  %v1861_v36 = vpack.c.bf16 %v1805_v17, %v1803_v61  ;;  %v1674_v27 = vadd.f32 %v1673_v52, %v1481_v10  ;;  %v1806_v19 = vmax.f32 %v1672_v23, 0.0 }
 0x1a8   :  { %v1484_v31 = vpop.f32.mrf.mxu0 }
 0x1a9   :  { %v1677_v58 = vpop.f32.mrf.mxu1  ;;  %v1676_v35 = vadd.f32 %v1675_v20, %v1483_v54  ;;  %v1485_v11 = vadd.f32 %v1484_v31, %v1292_v21  ;;  %2077 = vmatprep.mubr.bf16.mxu0 %v1861_v36  ;;  %v1807_v62 = vmax.f32 %v1674_v27, 0.0  ;;  %v1312_v36 = vadd.f32 %v4549_v28, %v1119_v15 }
 0x1aa   :  { %v1488_v40 = vpop.f32.mrf.mxu0  ;;  %2078 = vmatmul.mubr.bf16.gmra.mxu0 %v1860_v8 }
 0x1ab   :  { %v1681_v63 = vpop.f32.mrf.mxu1  ;;  %v1808_v24 = vmax.f32 %v1676_v35, 0.0  ;;  %v1678_v30 = vadd.f32 %v1677_v58, %v1485_v11  ;;  %v1489_v25 = vadd.f32 %v1488_v40, %v4514_v44  ;;  %v1129_v40 = vadd.f32 %v4561_v48, %v4324_v12 }
 0x1ac   :  { %v1490_v33 = vpop.f32.mrf.mxu0 }
 0x1ad   :  { %v1683_v26 = vpop.f32.mrf.mxu1  ;;  %v1862_v5 = vpack.c.bf16 %v1808_v24, %v1806_v19  ;;  %v1809_v55 = vmax.f32 %v1678_v30, 0.0  ;;  %v1491_v1 = vadd.f32 %v1490_v33, %v4517_v53  ;;  %v1682_v45 = vadd.f32 %v1681_v63, %v1489_v25 }
 0x1ae   :  { %v1492_v4 = vpop.f32.mrf.mxu0 }
 0x1af   :  { %v1685_v43 = vpop.f32.mrf.mxu1  ;;  %v1863_v56 = vpack.c.bf16 %v1809_v55, %v1807_v62  ;;  %v1493_v3 = vadd.f32 %v1492_v4, %v4524_v60  ;;  %v1684_v32 = vadd.f32 %v1683_v26, %v1491_v1  ;;  %v1810_v53 = vmax.f32 %v1682_v45, 0.0 }
 0x1b0   :  { %v1494_v37 = vpop.f32.mrf.mxu0  ;;  %v1322_v4 = vadd.f32 %v4563_v49, %v1129_v40 }
 0x1b1   :  { %v1687_v51 = vpop.f32.mrf.mxu1  ;;  %v1686_v16 = vadd.f32 %v1685_v43, %v1493_v3  ;;  %v1495_v44 = vadd.f32 %v1494_v37, %v1302_v6  ;;  %2085 = vmatprep.mubr.bf16.mxu0 %v1863_v56  ;;  %v1811_v60 = vmax.f32 %v1684_v32, 0.0 }
 0x1b2   :  { %v1498_v57 = vpop.f32.mrf.mxu0  ;;  %2086 = vmatmul.mubr.bf16.gmra.mxu0 %v1862_v5 }
 0x1b3   :  { %v1691_v52 = vpop.f32.mrf.mxu1  ;;  %v1812_v61 = vmax.f32 %v1686_v16, 0.0  ;;  %v1688_v8 = vadd.f32 %v1687_v51, %v1495_v44  ;;  %v1499_v59 = vadd.f32 %v1498_v57, %v4541_v9  ;;  %v1139_v51 = vadd.f32 %v4574_v13, %v4324_v12 }
 0x1b4   :  { %v1500_v17 = vpop.f32.mrf.mxu0 }
 0x1b5   :  { %v1693_v10 = vpop.f32.mrf.mxu1  ;;  %v1864_v0 = vpack.c.bf16 %v1812_v61, %v1810_v53  ;;  %v1813_v20 = vmax.f32 %v1688_v8, 0.0  ;;  %v1501_v21 = vadd.f32 %v1500_v17, %v4544_v18  ;;  %v1692_v31 = vadd.f32 %v1691_v52, %v1499_v59 }
 0x1b6   :  { %v1502_v23 = vpop.f32.mrf.mxu0 }
 0x1b7   :  { %v1695_v54 = vpop.f32.mrf.mxu1  ;;  %v1865_v22 = vpack.c.bf16 %v1813_v20, %v1811_v60  ;;  %v1503_v58 = vadd.f32 %v1502_v23, %v4551_v29  ;;  %v1694_v11 = vadd.f32 %v1693_v10, %v1501_v21  ;;  %v1814_v18 = vmax.f32 %v1692_v31, 0.0 }
 0x1b8   :  { %v1504_v27 = vpop.f32.mrf.mxu0  ;;  %v1332_v10 = vadd.f32 %v4576_v14, %v1139_v51 }
 0x1b9   :  { %v1697_v35 = vpop.f32.mrf.mxu1  ;;  %v1696_v42 = vadd.f32 %v1695_v54, %v1503_v58  ;;  %v1505_v9 = vadd.f32 %v1504_v27, %v1312_v36  ;;  %2093 = vmatprep.mubr.bf16.mxu0 %v1865_v22  ;;  %v1815_v29 = vmax.f32 %v1694_v11, 0.0  ;;  %v1149_v36 = vadd.f32 %v4587_v47, %v4324_v12 }
 0x1ba   :  { %v1508_v63 = vpop.f32.mrf.mxu0  ;;  %2094 = vmatmul.mubr.bf16.gmra.mxu0 %v1864_v0 }
 0x1bb   :  { %v1701_v19 = vpop.f32.mrf.mxu1  ;;  %v1816_v24 = vmax.f32 %v1696_v42, 0.0  ;;  %v1698_v30 = vadd.f32 %v1697_v35, %v1505_v9  ;;  %v1509_v28 = vadd.f32 %v1508_v63, %v4555_v38 }
 0x1bc   :  { %v1510_v25 = vpop.f32.mrf.mxu0 }
 0x1bd   :  { %v1703_v33 = vpop.f32.mrf.mxu1  ;;  %v1866_v26 = vpack.c.bf16 %v1816_v24, %v1814_v18  ;;  %v1817_v62 = vmax.f32 %v1698_v30, 0.0  ;;  %v1511_v5 = vadd.f32 %v1510_v25, %v4558_v46  ;;  %v1702_v43 = vadd.f32 %v1701_v19, %v1509_v28  ;;  %v5056_v18 = vld [vmem:[#allocation2_spill] sm:$0xff]  ;;  %v5057_v28 = vld [vmem:[#allocation3_spill] sm:$0xff] }
 0x1be   :  { %v1512_v55 = vpop.f32.mrf.mxu0  ;;  %v1342_v24 = vadd.f32 %v5056_v18, %v1149_v36  ;;  %v5064_v36 = vld [vmem:[#allocation9_spill] sm:$0xff] }
 0x1bf   :  { %v1705_v1 = vpop.f32.mrf.mxu1  ;;  %v1867_v48 = vpack.c.bf16 %v1817_v62, %v1815_v29  ;;  %v1513_v6 = vadd.f32 %v1512_v55, %v4565_v50  ;;  %v1704_v3 = vadd.f32 %v1703_v33, %v1511_v5  ;;  %v1818_v46 = vmax.f32 %v1702_v43, 0.0  ;;  %v5058_v5 = vld [vmem:[#allocation6_spill] sm:$0xff] }
 0x1c0   :  { %v1514_v56 = vpop.f32.mrf.mxu0  ;;  %v1159_v55 = vadd.f32 %v5058_v5, %v4324_v12 }
 0x1c1   :  { %v1707_v45 = vpop.f32.mrf.mxu1  ;;  %v1706_v37 = vadd.f32 %v1705_v1, %v1513_v6  ;;  %v1515_v38 = vadd.f32 %v1514_v56, %v1322_v4  ;;  %2101 = vmatprep.mubr.bf16.mxu0 %v1867_v48  ;;  %v1819_v50 = vmax.f32 %v1704_v3, 0.0  ;;  %v5059_v6 = vld [vmem:[#allocation4_spill] sm:$0xff] }
 0x1c2   :  { %v1518_v32 = vpop.f32.mrf.mxu0  ;;  %2102 = vmatmul.mubr.bf16.gmra.mxu0 %v1866_v26 }
 0x1c3   :  { %v1711_v16 = vpop.f32.mrf.mxu1  ;;  %v1820_v44 = vmax.f32 %v1706_v37, 0.0  ;;  %v1708_v15 = vadd.f32 %v1707_v45, %v1515_v38  ;;  %v1519_v49 = vadd.f32 %v1518_v32, %v4568_v2  ;;  %v5060_v32 = vld [vmem:[#allocation5_spill] sm:$0xff] }
 0x1c4   :  { %v1520_v57 = vpop.f32.mrf.mxu0 }
 0x1c5   :  { %v1713_v52 = vpop.f32.mrf.mxu1  ;;  %v1868_v53 = vpack.c.bf16 %v1820_v44, %v1818_v46  ;;  %v1821_v61 = vmax.f32 %v1708_v15, 0.0  ;;  %v1521_v8 = vadd.f32 %v1520_v57, %v4571_v7  ;;  %v1712_v60 = vadd.f32 %v1711_v16, %v1519_v49  ;;  %v5061_v15 = vld [vmem:[#allocation7_spill] sm:$0xff] }
 0x1c6   :  { %v1522_v59 = vpop.f32.mrf.mxu0  ;;  %v1352_v49 = vadd.f32 %v5061_v15, %v1159_v55 }
 0x1c7   :  { %v1715_v17 = vpop.f32.mrf.mxu1  ;;  %v1869_v13 = vpack.c.bf16 %v1821_v61, %v1819_v50  ;;  %v1523_v0 = vadd.f32 %v1522_v59, %v4578_v39  ;;  %v1714_v23 = vadd.f32 %v1713_v52, %v1521_v8  ;;  %v1822_v7 = vmax.f32 %v1712_v60, 0.0  ;;  %v5062_v50 = vld [vmem:[#allocation8_spill] sm:$0xff]  ;;  %v3351_v61 = vld [vmem:[%s5018_s5 + $0x18] sm:$0xff]   ;;  %v5063_v60 = vld [vmem:[#allocation11_spill] sm:$0xff] }
 0x1c8   :  { %v1524_v20 = vpop.f32.mrf.mxu0  ;;  %3095 = vmatprep.subr.bf16.mxu1 %v3351_v61 }
 0x1c9   :  { %v1717_v21 = vpop.f32.mrf.mxu1  ;;  %v1716_v54 = vadd.f32 %v1715_v17, %v1523_v0  ;;  %v1525_v2 = vadd.f32 %v1524_v20, %v1332_v10  ;;  %2109 = vmatprep.mubr.bf16.mxu0 %v1869_v13  ;;  %v1823_v39 = vmax.f32 %v1714_v23, 0.0  ;;  %v1169_v0 = vadd.f32 %v5063_v60, %v4324_v12  ;;  %3096 = vmatpush3.bf16.msra.mxu1 %v3351_v61 }
 0x1ca   :  { %v1528_v22 = vpop.f32.mrf.mxu0  ;;  %2110 = vmatmul.mubr.bf16.gmra.mxu0 %v1868_v53 }
 0x1cb   :  { %v1721_v31 = vpop.f32.mrf.mxu1  ;;  %v1824_v58 = vmax.f32 %v1716_v54, 0.0  ;;  %v1718_v27 = vadd.f32 %v1717_v21, %v1525_v2  ;;  %v1529_v14 = vadd.f32 %v1528_v22, %v4581_v34 }
 0x1cc   :  { %v1530_v35 = vpop.f32.mrf.mxu0 }
 0x1cd   :  { %v1723_v11 = vpop.f32.mrf.mxu1  ;;  %v1870_v42 = vpack.c.bf16 %v1824_v58, %v1822_v7  ;;  %v1825_v9 = vmax.f32 %v1718_v27, 0.0  ;;  %v1531_v40 = vadd.f32 %v1530_v35, %v4584_v41  ;;  %v1722_v30 = vadd.f32 %v1721_v31, %v1529_v14  ;;  %v3352_v31 = vld [vmem:[%s5018_s5 + $0x10] sm:$0xff]  }
 0x1ce   :  { %v1532_v63 = vpop.f32.mrf.mxu0  ;;  %3097 = vmatprep.subr.bf16.mxu1 %v3352_v31 }
 0x1cf   :  { %v1725_v19 = vpop.f32.mrf.mxu1  ;;  %v1871_v47 = vpack.c.bf16 %v1825_v9, %v1823_v39  ;;  %v1533_v25 = vadd.f32 %v1532_v63, %v5057_v28  ;;  %v1724_v26 = vadd.f32 %v1723_v11, %v1531_v40  ;;  %v1826_v41 = vmax.f32 %v1722_v30, 0.0  ;;  %v5065_v11 = vld [vmem:[#allocation10_spill] sm:$0xff]  ;;  %3098 = vmatpush3.bf16.msra.mxu1 %v3352_v31  ;;  %v5066_v40 = vld [vmem:[#allocation12_spill] sm:$0xff]  ;;  %v3353_v30 = vld [vmem:[%s5018_s5 + $0x8] sm:$0xff]  }
 0x1d0   :  { %v1534_v33 = vpop.f32.mrf.mxu0  ;;  %v1362_v63 = vadd.f32 %v5066_v40, %v1169_v0  ;;  %3099 = vmatprep.subr.bf16.mxu1 %v3353_v30 }
 0x1d1   :  { %v1727_v29 = vpop.f32.mrf.mxu1  ;;  %v1726_v62 = vadd.f32 %v1725_v19, %v1533_v25  ;;  %v1535_v34 = vadd.f32 %v1534_v33, %v1342_v24  ;;  %2117 = vmatprep.mubr.bf16.mxu0 %v1871_v47  ;;  %v1827_v37 = vmax.f32 %v1724_v26, 0.0  ;;  %v5067_v24 = vld [vmem:[#allocation13_spill] sm:$0xff] }
 0x1d2   :  { %v1538_v1 = vpop.f32.mrf.mxu0  ;;  %2118 = vmatmul.mubr.bf16.gmra.mxu0 %v1870_v42 }
 0x1d3   :  { %v1731_v4 = vpop.f32.mrf.mxu1  ;;  %v1828_v48 = vmax.f32 %v1726_v62, 0.0  ;;  %v1728_v43 = vadd.f32 %v1727_v29, %v1535_v34  ;;  %v1539_v56 = vadd.f32 %v1538_v1, %v5059_v6  ;;  %v5068_v62 = vld [vmem:[#allocation16_spill] sm:$0xff]  ;;  %3100 = vmatpush3.bf16.msra.mxu1 %v3353_v30  ;;  %v3354_v6 = vld [vmem:[%s5018_s5] sm:$0xff]  }
 0x1d4   :  { %v1540_v45 = vpop.f32.mrf.mxu0  ;;  %v1179_v34 = vadd.f32 %v5068_v62, %v4324_v12  ;;  %3101 = vmatprep.subr.bf16.mxu1 %v3354_v6 }
 0x1d5   :  { %v1733_v3 = vpop.f32.mrf.mxu1  ;;  %v1872_v38 = vpack.c.bf16 %v1828_v48, %v1826_v41  ;;  %v1829_v51 = vmax.f32 %v1728_v43, 0.0  ;;  %v1541_v16 = vadd.f32 %v1540_v45, %v5060_v32  ;;  %v1732_v52 = vadd.f32 %v1731_v4, %v1539_v56  ;;  %v5069_v48 = vld [vmem:[#allocation14_spill] sm:$0xff] }
 0x1d6   :  { %v1542_v46 = vpop.f32.mrf.mxu0 }
 0x1d7   :  { %v1735_v44 = vpop.f32.mrf.mxu1  ;;  %v1873_v57 = vpack.c.bf16 %v1829_v51, %v1827_v37  ;;  %v1543_v53 = vadd.f32 %v1542_v46, %v5062_v50  ;;  %v1734_v17 = vadd.f32 %v1733_v3, %v1541_v16  ;;  %v1830_v23 = vmax.f32 %v1732_v52, 0.0  ;;  %v5070_v51 = vld [vmem:[#allocation15_spill] sm:$0xff]  ;;  %3102 = vmatpush3.bf16.msra.mxu1 %v3354_v6  ;;  %v5072_v52 = vld [vmem:[#allocation18_spill] sm:$0xff] }
 0x1d8   :  { %v1544_v8 = vpop.f32.mrf.mxu0 }
 0x1d9   :  { %v1737_v59 = vpop.f32.mrf.mxu1  ;;  %v1736_v10 = vadd.f32 %v1735_v44, %v1543_v53  ;;  %v1545_v13 = vadd.f32 %v1544_v8, %v1352_v49  ;;  %2125 = vmatprep.mubr.bf16.mxu0 %v1873_v57  ;;  %v1831_v27 = vmax.f32 %v1734_v17, 0.0  ;;  %v5071_v44 = vld [vmem:[#allocation17_spill] sm:$0xff] }
 0x1da   :  { %v1548_v20 = vpop.f32.mrf.mxu0  ;;  %2126 = vmatmul.mubr.bf16.gmra.mxu0 %v1872_v38  ;;  %v1372_v15 = vadd.f32 %v5071_v44, %v1179_v34 }
 0x1db   :  { %v1741_v21 = vpop.f32.mrf.mxu1  ;;  %v1832_v54 = vmax.f32 %v1736_v10, 0.0  ;;  %v1738_v2 = vadd.f32 %v1737_v59, %v1545_v13  ;;  %v1549_v22 = vadd.f32 %v1548_v20, %v5064_v36  ;;  %v5073_v10 = vld [vmem:[#allocation21_spill] sm:$0xff] }
 0x1dc   :  { %v1550_v7 = vpop.f32.mrf.mxu0  ;;  %v1189_v13 = vadd.f32 %v5073_v10, %v4324_v12 }
 0x1dd   :  { %v1743_v58 = vpop.f32.mrf.mxu1  ;;  %v1874_v14 = vpack.c.bf16 %v1832_v54, %v1830_v23  ;;  %v1833_v35 = vmax.f32 %v1738_v2, 0.0  ;;  %v1551_v39 = vadd.f32 %v1550_v7, %v5065_v11  ;;  %v1742_v18 = vadd.f32 %v1741_v21, %v1549_v22  ;;  %v5074_v54 = vld [vmem:[#allocation19_spill] sm:$0xff] }
 0x1de   :  { %v1552_v42 = vpop.f32.mrf.mxu0 }
 0x1df   :  { %v1745_v9 = vpop.f32.mrf.mxu1  ;;  %v1875_v19 = vpack.c.bf16 %v1833_v35, %v1831_v27  ;;  %v1553_v47 = vadd.f32 %v1552_v42, %v5067_v24  ;;  %v1744_v33 = vadd.f32 %v1743_v58, %v1551_v39  ;;  %v1834_v1 = vmax.f32 %v1742_v18, 0.0  ;;  %v5075_v27 = vld [vmem:[#allocation20_spill] sm:$0xff]  ;;  %v5076_v39 = vld [vmem:[#allocation22_spill] sm:$0xff] }
 0x1e0   :  { %v1554_v28 = vpop.f32.mrf.mxu0  ;;  %v1382_v42 = vadd.f32 %v5076_v39, %v1189_v13 }
 0x1e1   :  { %v1747_v25 = vpop.f32.mrf.mxu1  ;;  %v1746_v29 = vadd.f32 %v1745_v9, %v1553_v47  ;;  %v1555_v26 = vadd.f32 %v1554_v28, %v1362_v63  ;;  %2133 = vmatprep.mubr.bf16.mxu0 %v1875_v19  ;;  %v1835_v3 = vmax.f32 %v1744_v33, 0.0  ;;  %v5077_v63 = vld [vmem:[#allocation23_spill] sm:$0xff] }
 0x1e2   :  { %v1558_v5 = vpop.f32.mrf.mxu0  ;;  %2134 = vmatmul.mubr.bf16.gmra.mxu0 %v1874_v14 }
 0x1e3   :  { %v1751_v55 = vpop.f32.mrf.mxu1  ;;  %v1836_v4 = vmax.f32 %v1746_v29, 0.0  ;;  %v1748_v41 = vadd.f32 %v1747_v25, %v1555_v26  ;;  %v1559_v43 = vadd.f32 %v1558_v5, %v5069_v48  ;;  %v5078_v25 = vld [vmem:[#allocation26_spill] sm:$0xff] }
 0x1e4   :  { %v1560_v56 = vpop.f32.mrf.mxu0  ;;  %v1199_v33 = vadd.f32 %v5078_v25, %v4324_v12 }
 0x1e5   :  { %v1753_v45 = vpop.f32.mrf.mxu1  ;;  %v1876_v37 = vpack.c.bf16 %v1836_v4, %v1834_v1  ;;  %v1837_v38 = vmax.f32 %v1748_v41, 0.0  ;;  %v1561_v32 = vadd.f32 %v1560_v56, %v5070_v51  ;;  %v1752_v57 = vadd.f32 %v1751_v55, %v1559_v43  ;;  %v5079_v55 = vld [vmem:[#allocation24_spill] sm:$0xff]  ;;  %v5080_v56 = vld [vmem:[#allocation25_spill] sm:$0xff] }
 0x1e6   :  { %v1562_v16 = vpop.f32.mrf.mxu0 }
 0x1e7   :  { %v1755_v46 = vpop.f32.mrf.mxu1  ;;  %v1877_v49 = vpack.c.bf16 %v1837_v38, %v1835_v3  ;;  %v1563_v50 = vadd.f32 %v1562_v16, %v5072_v52  ;;  %v1754_v8 = vadd.f32 %v1753_v45, %v1561_v32  ;;  %v1838_v20 = vmax.f32 %v1752_v57, 0.0  ;;  %v5081_v38 = vld [vmem:[#allocation27_spill] sm:$0xff] }
 0x1e8   :  { %v1564_v53 = vpop.f32.mrf.mxu0  ;;  %v1392_v51 = vadd.f32 %v5081_v38, %v1199_v33 }
 0x1e9   :  { %v1757_v61 = vpop.f32.mrf.mxu1  ;;  %v1756_v59 = vadd.f32 %v1755_v46, %v1563_v50  ;;  %v1565_v17 = vadd.f32 %v1564_v53, %v1372_v15  ;;  %2141 = vmatprep.mubr.bf16.mxu0 %v1877_v49  ;;  %v1839_v31 = vmax.f32 %v1754_v8, 0.0  ;;  %v5082_v46 = vld [vmem:[#allocation28_spill] sm:$0xff]  ;;  %v5083_v53 = vld [vmem:[#allocation31_spill] sm:$0xff] }
 0x1ea   :  { %v1568_v60 = vpop.f32.mrf.mxu0  ;;  %2142 = vmatmul.mubr.bf16.gmra.mxu0 %v1876_v37 }
 0x1eb   :  { %v1761_v0 = vpop.f32.mrf.mxu1  ;;  %v1840_v21 = vmax.f32 %v1756_v59, 0.0  ;;  %v1758_v23 = vadd.f32 %v1757_v61, %v1565_v17  ;;  %v1569_v2 = vadd.f32 %v1568_v60, %v5074_v54  ;;  %v1209_v61 = vadd.f32 %v5083_v53, %v4324_v12  ;;  %v5084_v60 = vld [vmem:[#allocation29_spill] sm:$0xff]  ;;  %v3356_v53 = vld [vmem:[%s5020_s7 + $0x30] sm:$0xff]  }
 0x1ec   :  { %v1570_v36 = vpop.f32.mrf.mxu0 }
 0x1ed   :  { %v1763_v22 = vpop.f32.mrf.mxu1  ;;  %v1878_v7 = vpack.c.bf16 %v1840_v21, %v1838_v20  ;;  %v1841_v58 = vmax.f32 %v1758_v23, 0.0  ;;  %v1571_v14 = vadd.f32 %v1570_v36, %v5075_v27  ;;  %v1762_v40 = vadd.f32 %v1761_v0, %v1569_v2  ;;  %v5085_v36 = vld [vmem:[#allocation30_spill] sm:$0xff] }
 0x1ee   :  { %v1572_v35 = vpop.f32.mrf.mxu0 }
 0x1ef   :  { %v1765_v11 = vpop.f32.mrf.mxu1  ;;  %v1879_v9 = vpack.c.bf16 %v1841_v58, %v1839_v31  ;;  %v1573_v19 = vadd.f32 %v1572_v35, %v5077_v63  ;;  %v1764_v47 = vadd.f32 %v1763_v22, %v1571_v14  ;;  %v1842_v62 = vmax.f32 %v1762_v40, 0.0  ;;  %v5086_v58 = vld [vmem:[#allocation32_spill] sm:$0xff]  ;;  %v5087_v35 = vld [vmem:[#allocation33_spill] sm:$0xff] }
 0x1f0   :  { %v1574_v18 = vpop.f32.mrf.mxu0  ;;  %v1402_v27 = vadd.f32 %v5086_v58, %v1209_v61 }
 0x1f1   :  { %v1767_v24 = vpop.f32.mrf.mxu1  ;;  %v1766_v30 = vadd.f32 %v1765_v11, %v1573_v19  ;;  %v1575_v28 = vadd.f32 %v1574_v18, %v1382_v42  ;;  %2149 = vmatprep.mubr.bf16.mxu0 %v1879_v9  ;;  %v1843_v48 = vmax.f32 %v1764_v47, 0.0 }
 0x1f2   :  { %v1578_v29 = vpop.f32.mrf.mxu0  ;;  %2150 = vmatmul.mubr.bf16.gmra.mxu0 %v1878_v7 }
 0x1f3   :  { %v1771_v26 = vpop.f32.mrf.mxu1  ;;  %v1844_v34 = vmax.f32 %v1766_v30, 0.0  ;;  %v1768_v5 = vadd.f32 %v1767_v24, %v1575_v28  ;;  %v1579_v1 = vadd.f32 %v1578_v29, %v5079_v55 }
 0x1f4   :  { %v1580_v4 = vpop.f32.mrf.mxu0 }
 0x1f5   :  { %v1773_v41 = vpop.f32.mrf.mxu1  ;;  %v1880_v43 = vpack.c.bf16 %v1844_v34, %v1842_v62  ;;  %v1845_v6 = vmax.f32 %v1768_v5, 0.0  ;;  %v1581_v45 = vadd.f32 %v1580_v4, %v5080_v56  ;;  %v1772_v16 = vadd.f32 %v1771_v26, %v1579_v1  ;;  %v4786_v62 = vld [vmem:[%s5019_s4] ss:$0 sm:$0xff] }
 0x1f6   :  { %v1582_v3 = vpop.f32.mrf.mxu0 }
 0x1f7   :  { %v1775_v37 = vpop.f32.mrf.mxu1  ;;  %v1881_v32 = vpack.c.bf16 %v1845_v6, %v1843_v48  ;;  %v1583_v44 = vadd.f32 %v1582_v3, %v5082_v46  ;;  %v1774_v57 = vadd.f32 %v1773_v41, %v1581_v45  ;;  %v1846_v17 = vmax.f32 %v1772_v16, 0.0  ;;  %v3355_v41 = vld [vmem:[%s5020_s7 + $0x38] sm:$0xff]  }
 0x1f8   :  { %v1584_v15 = vpop.f32.mrf.mxu0  ;;  %3135 = vmatprep.subr.bf16.mxu1 %v3355_v41 }
 0x1f9   :  { %v1777_v49 = vpop.f32.mrf.mxu1  ;;  %v1776_v52 = vadd.f32 %v1775_v37, %v1583_v44  ;;  %v1585_v50 = vadd.f32 %v1584_v15, %v1392_v51  ;;  %2157 = vmatprep.mubr.bf16.mxu0 %v1881_v32  ;;  %v1847_v23 = vmax.f32 %v1774_v57, 0.0 }
 0x1fa   :  { %v1588_v8 = vpop.f32.mrf.mxu0  ;;  %2158 = vmatmul.mubr.bf16.gmra.mxu0 %v1880_v43 }
 0x1fb   :  { %v1781_v59 = vpop.f32.mrf.mxu1  ;;  %v1848_v10 = vmax.f32 %v1776_v52, 0.0  ;;  %v1778_v13 = vadd.f32 %v1777_v49, %v1585_v50  ;;  %v1589_v0 = vadd.f32 %v1588_v8, %v5084_v60 }
 0x1fc   :  { %v1590_v20 = vpop.f32.mrf.mxu0 }
 0x1fd   :  { %v1783_v21 = vpop.f32.mrf.mxu1  ;;  %v1882_v54 = vpack.c.bf16 %v1848_v10, %v1846_v17  ;;  %v1849_v2 = vmax.f32 %v1778_v13, 0.0  ;;  %v1591_v22 = vadd.f32 %v1590_v20, %v5085_v36  ;;  %v1782_v14 = vadd.f32 %v1781_v59, %v1589_v0  ;;  %v3357_v13 = vld [vmem:[%s5020_s7 + $0x28] sm:$0xff]  }
 0x1fe   :  { %v1592_v31 = vpop.f32.mrf.mxu0 }
 0x1ff   :  { %v1785_v7 = vpop.f32.mrf.mxu1  ;;  %v1883_v12 = vpack.c.bf16 %v1849_v2, %v1847_v23  ;;  %v1593_v11 = vadd.f32 %v1592_v31, %v5087_v35  ;;  %v1784_v42 = vadd.f32 %v1783_v21, %v1591_v22  ;;  %v1850_v19 = vmax.f32 %v1782_v14, 0.0  ;;  %v3358_v2 = vld [vmem:[%s5020_s7 + $0x20] sm:$0xff]  }
 0x200   :  { %v1594_v39 = vpop.f32.mrf.mxu0 }
 0x201   :  { %v1786_v9 = vadd.f32 %v1785_v7, %v1593_v11  ;;  %v1595_v40 = vadd.f32 %v1594_v39, %v1402_v27  ;;  %2165 = vmatprep.mubr.bf16.mxu0 %v1883_v12  ;;  %v1787_v63 = vpop.f32.mrf.mxu1  ;;  %v1851_v47 = vmax.f32 %v1784_v42, 0.0  ;;  %v3359_v27 = vld [vmem:[%s5020_s7 + $0x18] sm:$0xff]  }
 0x202   :  { %2166 = vmatmul.mubr.bf16.gmra.mxu0 %v1882_v54 }
 0x203   :  { %v1852_v18 = vmax.f32 %v1786_v9, 0.0  ;;  %v1788_v24 = vadd.f32 %v1787_v63, %v1595_v40 }
 0x205   :  { %v1884_v30 = vpack.c.bf16 %v1852_v18, %v1850_v19  ;;  %v1853_v28 = vmax.f32 %v1788_v24, 0.0 }
 0x207   :  { %v1885_v25 = vpack.c.bf16 %v1853_v28, %v1851_v47 }
 0x209   :  { %2173 = vmatprep.mubr.bf16.mxu0 %v1885_v25 }
 0x20a   :  { %2174 = vmatmul.mubr.bf16.gmra.mxu0 %v1884_v30 }
 0x252   :  { %v2943_v33 = vpop.f32.mrf.mxu0 }
 0x254   :  { %v2944_v29 = vpop.f32.mrf.mxu0 }
 0x255   :  { %v2945_v26 = vadd.f32 %v2944_v29, %v2943_v33 }
 0x256   :  { %v2946_v34 = vpop.f32.mrf.mxu0 }
 0x257   :  { %v2056_v55 = vadd.f32 %v2945_v26, %v4786_v62 }
 0x258   :  { %v2947_v5 = vpop.f32.mrf.mxu0 }
 0x259   :  { %v2948_v1 = vadd.f32 %v2947_v5, %v2946_v34  ;;  %v2182_v6 = vmax.f32 %v2056_v55, 0.0 }
 0x25a   :  { %v2949_v4 = vpop.f32.mrf.mxu0 }
 0x25b   :  { %v2059_v48 = vadd.f32 %v2948_v1, %v4786_v62 }
 0x25c   :  { %v2950_v43 = vpop.f32.mrf.mxu0 }
 0x25d   :  { %v2183_v56 = vmax.f32 %v2059_v48, 0.0  ;;  %v2951_v45 = vadd.f32 %v2950_v43, %v2949_v4 }
 0x25e   :  { %v2952_v3 = vpop.f32.mrf.mxu0 }
 0x25f   :  { %v2214_v37 = vpack.c.bf16 %v2183_v56, %v2182_v6  ;;  %v2064_v51 = vadd.f32 %v2951_v45, %v4786_v62 }
 0x260   :  { %v2953_v38 = vpop.f32.mrf.mxu0 }
 0x261   :  { %v2954_v32 = vadd.f32 %v2953_v38, %v2952_v3  ;;  %3103 = vmatprep.mubr.bf16.mxu1 %v2214_v37  ;;  %v2184_v15 = vmax.f32 %v2064_v51, 0.0 }
 0x262   :  { %v2955_v16 = vpop.f32.mrf.mxu0 }
 0x263   :  { %v2067_v46 = vadd.f32 %v2954_v32, %v4786_v62 }
 0x264   :  { %v2956_v44 = vpop.f32.mrf.mxu0 }
 0x265   :  { %v2185_v49 = vmax.f32 %v2067_v46, 0.0  ;;  %v2957_v57 = vadd.f32 %v2956_v44, %v2955_v16 }
 0x266   :  { %v2958_v52 = vpop.f32.mrf.mxu0 }
 0x267   :  { %v2215_v50 = vpack.c.bf16 %v2185_v49, %v2184_v15  ;;  %v2072_v8 = vadd.f32 %v2957_v57, %v4786_v62 }
 0x268   :  { %v2959_v61 = vpop.f32.mrf.mxu0 }
 0x269   :  { %v2960_v59 = vadd.f32 %v2959_v61, %v2958_v52  ;;  %3104 = vmatmul.mubr.bf16.vlgmr.msra.gmra.mxu1 %v2215_v50  ;;  %v2186_v0 = vmax.f32 %v2072_v8, 0.0 }
 0x26a   :  { %v2961_v17 = vpop.f32.mrf.mxu0  ;;  %3136 = vmatpush3.bf16.msra.mxu1 %v3355_v41 }
 0x26b   :  { %v2075_v10 = vadd.f32 %v2960_v59, %v4786_v62  ;;  %3137 = vmatprep.subr.bf16.mxu1 %v3356_v53 }
 0x26c   :  { %v2962_v60 = vpop.f32.mrf.mxu0 }
 0x26d   :  { %v2187_v20 = vmax.f32 %v2075_v10, 0.0  ;;  %v2963_v21 = vadd.f32 %v2962_v60, %v2961_v17 }
 0x26e   :  { %v2964_v23 = vpop.f32.mrf.mxu0  ;;  %3138 = vmatpush3.bf16.msra.mxu1 %v3356_v53 }
 0x26f   :  { %v2216_v54 = vpack.c.bf16 %v2187_v20, %v2186_v0  ;;  %3139 = vmatprep.subr.bf16.mxu1 %v3357_v13  ;;  %v2080_v22 = vadd.f32 %v2963_v21, %v4786_v62 }
 0x270   :  { %v2965_v36 = vpop.f32.mrf.mxu0 }
 0x271   :  { %v2966_v31 = vadd.f32 %v2965_v36, %v2964_v23  ;;  %3107 = vmatprep.mubr.bf16.mxu1 %v2216_v54  ;;  %v2188_v14 = vmax.f32 %v2080_v22, 0.0 }
 0x272   :  { %v2967_v7 = vpop.f32.mrf.mxu0  ;;  %3140 = vmatpush3.bf16.msra.mxu1 %v3357_v13 }
 0x273   :  { %v2083_v58 = vadd.f32 %v2966_v31, %v4786_v62  ;;  %3141 = vmatprep.subr.bf16.mxu1 %v3358_v2 }
 0x274   :  { %v2968_v12 = vpop.f32.mrf.mxu0 }
 0x275   :  { %v2189_v35 = vmax.f32 %v2083_v58, 0.0  ;;  %v2969_v11 = vadd.f32 %v2968_v12, %v2967_v7 }
 0x276   :  { %v2970_v39 = vpop.f32.mrf.mxu0  ;;  %3142 = vmatpush3.bf16.msra.mxu1 %v3358_v2 }
 0x277   :  { %v2217_v42 = vpack.c.bf16 %v2189_v35, %v2188_v14  ;;  %3143 = vmatprep.subr.bf16.mxu1 %v3359_v27  ;;  %v2088_v40 = vadd.f32 %v2969_v11, %v4786_v62 }
 0x278   :  { %v2971_v9 = vpop.f32.mrf.mxu0 }
 0x279   :  { %v2972_v63 = vadd.f32 %v2971_v9, %v2970_v39  ;;  %3108 = vmatmul.mubr.bf16.gmra.mxu1 %v2217_v42  ;;  %v2190_v47 = vmax.f32 %v2088_v40, 0.0 }
 0x27a   :  { %v2973_v19 = vpop.f32.mrf.mxu0  ;;  %3144 = vmatpush3.bf16.msra.mxu1 %v3359_v27 }
 0x27b   :  { %v2091_v18 = vadd.f32 %v2972_v63, %v4786_v62 }
 0x27c   :  { %v2974_v24 = vpop.f32.mrf.mxu0 }
 0x27d   :  { %v2191_v30 = vmax.f32 %v2091_v18, 0.0  ;;  %v2975_v28 = vadd.f32 %v2974_v24, %v2973_v19 }
 0x27e   :  { %v2976_v25 = vpop.f32.mrf.mxu0 }
 0x27f   :  { %v2218_v33 = vpack.c.bf16 %v2191_v30, %v2190_v47  ;;  %v2096_v26 = vadd.f32 %v2975_v28, %v4786_v62  ;;  %v3360_v47 = vld [vmem:[%s5020_s7 + $0x10] sm:$0xff]  }
 0x280   :  { %v2977_v29 = vpop.f32.mrf.mxu0  ;;  %3145 = vmatprep.subr.bf16.mxu1 %v3360_v47 }
 0x281   :  { %v2978_v34 = vadd.f32 %v2977_v29, %v2976_v25  ;;  %3111 = vmatprep.mubr.bf16.mxu1 %v2218_v33  ;;  %v2192_v4 = vmax.f32 %v2096_v26, 0.0  ;;  %3146 = vmatpush3.bf16.msra.mxu1 %v3360_v47 }
 0x282   :  { %v2979_v5 = vpop.f32.mrf.mxu0 }
 0x283   :  { %v2099_v55 = vadd.f32 %v2978_v34, %v4786_v62  ;;  %v3361_v34 = vld [vmem:[%s5020_s7 + $0x8] sm:$0xff]  }
 0x284   :  { %v2980_v1 = vpop.f32.mrf.mxu0  ;;  %3147 = vmatprep.subr.bf16.mxu1 %v3361_v34 }
 0x285   :  { %v2193_v41 = vmax.f32 %v2099_v55, 0.0  ;;  %v2981_v48 = vadd.f32 %v2980_v1, %v2979_v5  ;;  %3148 = vmatpush3.bf16.msra.mxu1 %v3361_v34 }
 0x286   :  { %v2982_v43 = vpop.f32.mrf.mxu0 }
 0x287   :  { %v2219_v6 = vpack.c.bf16 %v2193_v41, %v2192_v4  ;;  %v2104_v45 = vadd.f32 %v2981_v48, %v4786_v62  ;;  %v3362_v48 = vld [vmem:[%s5020_s7] sm:$0xff]  }
 0x288   :  { %v2983_v56 = vpop.f32.mrf.mxu0  ;;  %3149 = vmatprep.subr.bf16.mxu1 %v3362_v48 }
 0x289   :  { %v2984_v3 = vadd.f32 %v2983_v56, %v2982_v43  ;;  %3112 = vmatmul.mubr.bf16.gmra.mxu1 %v2219_v6  ;;  %v2194_v32 = vmax.f32 %v2104_v45, 0.0 }
 0x28a   :  { %v2985_v37 = vpop.f32.mrf.mxu0  ;;  %3150 = vmatpush3.bf16.msra.mxu1 %v3362_v48 }
 0x28b   :  { %v2107_v38 = vadd.f32 %v2984_v3, %v4786_v62 }
 0x28c   :  { %v2986_v51 = vpop.f32.mrf.mxu0 }
 0x28d   :  { %v2195_v16 = vmax.f32 %v2107_v38, 0.0  ;;  %v2987_v46 = vadd.f32 %v2986_v51, %v2985_v37 }
 0x28e   :  { %v2988_v44 = vpop.f32.mrf.mxu0 }
 0x28f   :  { %v2220_v15 = vpack.c.bf16 %v2195_v16, %v2194_v32  ;;  %v2112_v57 = vadd.f32 %v2987_v46, %v4786_v62 }
 0x290   :  { %v2989_v49 = vpop.f32.mrf.mxu0 }
 0x291   :  { %v2990_v52 = vadd.f32 %v2989_v49, %v2988_v44  ;;  %3115 = vmatprep.mubr.bf16.mxu1 %v2220_v15  ;;  %v2196_v8 = vmax.f32 %v2112_v57, 0.0 }
 0x292   :  { %v2991_v50 = vpop.f32.mrf.mxu0 }
 0x293   :  { %v2115_v53 = vadd.f32 %v2990_v52, %v4786_v62 }
 0x294   :  { %v2992_v61 = vpop.f32.mrf.mxu0 }
 0x295   :  { %v2197_v59 = vmax.f32 %v2115_v53, 0.0  ;;  %v2993_v17 = vadd.f32 %v2992_v61, %v2991_v50 }
 0x296   :  { %v2994_v10 = vpop.f32.mrf.mxu0 }
 0x297   :  { %v2221_v13 = vpack.c.bf16 %v2197_v59, %v2196_v8  ;;  %v2120_v0 = vadd.f32 %v2993_v17, %v4786_v62 }
 0x298   :  { %v2995_v60 = vpop.f32.mrf.mxu0 }
 0x299   :  { %v2996_v20 = vadd.f32 %v2995_v60, %v2994_v10  ;;  %3116 = vmatmul.mubr.bf16.gmra.mxu1 %v2221_v13  ;;  %v2198_v2 = vmax.f32 %v2120_v0, 0.0 }
 0x29a   :  { %v2997_v21 = vpop.f32.mrf.mxu0 }
 0x29b   :  { %v2123_v23 = vadd.f32 %v2996_v20, %v4786_v62 }
 0x29c   :  { %v2998_v54 = vpop.f32.mrf.mxu0 }
 0x29d   :  { %v2199_v36 = vmax.f32 %v2123_v23, 0.0  ;;  %v2999_v22 = vadd.f32 %v2998_v54, %v2997_v21 }
 0x29e   :  { %v3000_v31 = vpop.f32.mrf.mxu0 }
 0x29f   :  { %v2222_v7 = vpack.c.bf16 %v2199_v36, %v2198_v2  ;;  %v2128_v27 = vadd.f32 %v2999_v22, %v4786_v62 }
 0x2a0   :  { %v3001_v58 = vpop.f32.mrf.mxu0 }
 0x2a1   :  { %v3002_v12 = vadd.f32 %v3001_v58, %v3000_v31  ;;  %3119 = vmatprep.mubr.bf16.mxu1 %v2222_v7  ;;  %v2200_v39 = vmax.f32 %v2128_v27, 0.0 }
 0x2a2   :  { %v3003_v14 = vpop.f32.mrf.mxu0 }
 0x2a3   :  { %v2131_v35 = vadd.f32 %v3002_v12, %v4786_v62 }
 0x2a4   :  { %v3004_v11 = vpop.f32.mrf.mxu0 }
 0x2a5   :  { %v2201_v42 = vmax.f32 %v2131_v35, 0.0  ;;  %v3005_v9 = vadd.f32 %v3004_v11, %v3003_v14 }
 0x2a6   :  { %v3006_v40 = vpop.f32.mrf.mxu0 }
 0x2a7   :  { %v2223_v63 = vpack.c.bf16 %v2201_v42, %v2200_v39  ;;  %v2136_v18 = vadd.f32 %v3005_v9, %v4786_v62 }
 0x2a8   :  { %v3007_v19 = vpop.f32.mrf.mxu0 }
 0x2a9   :  { %v3008_v24 = vadd.f32 %v3007_v19, %v3006_v40  ;;  %3120 = vmatmul.mubr.bf16.gmra.mxu1 %v2223_v63  ;;  %v2202_v33 = vmax.f32 %v2136_v18, 0.0 }
 0x2aa   :  { %v3009_v30 = vpop.f32.mrf.mxu0 }
 0x2ab   :  { %v2139_v28 = vadd.f32 %v3008_v24, %v4786_v62 }
 0x2ac   :  { %v3010_v25 = vpop.f32.mrf.mxu0 }
 0x2ad   :  { %v2203_v29 = vmax.f32 %v2139_v28, 0.0  ;;  %v3011_v26 = vadd.f32 %v3010_v25, %v3009_v30  ;;  %v4847_v30 = vld [vmem:[%s5021_s6] ss:$0 sm:$0xff] }
 0x2ae   :  { %v3012_v5 = vpop.f32.mrf.mxu0 }
 0x2af   :  { %v2224_v55 = vpack.c.bf16 %v2203_v29, %v2202_v33  ;;  %v2144_v4 = vadd.f32 %v3011_v26, %v4786_v62 }
 0x2b0   :  { %v3013_v1 = vpop.f32.mrf.mxu0 }
 0x2b1   :  { %v3014_v41 = vadd.f32 %v3013_v1, %v3012_v5  ;;  %3123 = vmatprep.mubr.bf16.mxu1 %v2224_v55  ;;  %v2204_v45 = vmax.f32 %v2144_v4, 0.0 }
 0x2b2   :  { %v3015_v43 = vpop.f32.mrf.mxu0 }
 0x2b3   :  { %v2147_v6 = vadd.f32 %v3014_v41, %v4786_v62 }
 0x2b4   :  { %v3016_v56 = vpop.f32.mrf.mxu0 }
 0x2b5   :  { %v2205_v3 = vmax.f32 %v2147_v6, 0.0  ;;  %v3017_v37 = vadd.f32 %v3016_v56, %v3015_v43 }
 0x2b6   :  { %v3018_v38 = vpop.f32.mrf.mxu0 }
 0x2b7   :  { %v2225_v51 = vpack.c.bf16 %v2205_v3, %v2204_v45  ;;  %v2152_v16 = vadd.f32 %v3017_v37, %v4786_v62 }
 0x2b8   :  { %v3019_v32 = vpop.f32.mrf.mxu0 }
 0x2b9   :  { %v3020_v46 = vadd.f32 %v3019_v32, %v3018_v38  ;;  %3124 = vmatmul.mubr.bf16.gmra.mxu1 %v2225_v51  ;;  %v2206_v57 = vmax.f32 %v2152_v16, 0.0 }
 0x2ba   :  { %v3021_v44 = vpop.f32.mrf.mxu0 }
 0x2bb   :  { %v2155_v15 = vadd.f32 %v3020_v46, %v4786_v62 }
 0x2bc   :  { %v3022_v49 = vpop.f32.mrf.mxu0 }
 0x2bd   :  { %v2207_v52 = vmax.f32 %v2155_v15, 0.0  ;;  %v3023_v50 = vadd.f32 %v3022_v49, %v3021_v44 }
 0x2be   :  { %v3024_v53 = vpop.f32.mrf.mxu0 }
 0x2bf   :  { %v2226_v61 = vpack.c.bf16 %v2207_v52, %v2206_v57  ;;  %v2160_v59 = vadd.f32 %v3023_v50, %v4786_v62 }
 0x2c0   :  { %v3025_v8 = vpop.f32.mrf.mxu0 }
 0x2c1   :  { %v3026_v17 = vadd.f32 %v3025_v8, %v3024_v53  ;;  %3127 = vmatprep.mubr.bf16.mxu1 %v2226_v61  ;;  %v2208_v0 = vmax.f32 %v2160_v59, 0.0 }
 0x2c2   :  { %v3027_v10 = vpop.f32.mrf.mxu0 }
 0x2c3   :  { %v2163_v13 = vadd.f32 %v3026_v17, %v4786_v62 }
 0x2c4   :  { %v3028_v60 = vpop.f32.mrf.mxu0 }
 0x2c5   :  { %v2209_v20 = vmax.f32 %v2163_v13, 0.0  ;;  %v3029_v21 = vadd.f32 %v3028_v60, %v3027_v10 }
 0x2c6   :  { %v3030_v23 = vpop.f32.mrf.mxu0 }
 0x2c7   :  { %v2227_v54 = vpack.c.bf16 %v2209_v20, %v2208_v0  ;;  %v2168_v36 = vadd.f32 %v3029_v21, %v4786_v62 }
 0x2c8   :  { %v3031_v2 = vpop.f32.mrf.mxu0 }
 0x2c9   :  { %v3032_v22 = vadd.f32 %v3031_v2, %v3030_v23  ;;  %3128 = vmatmul.mubr.bf16.gmra.mxu1 %v2227_v54  ;;  %v2210_v27 = vmax.f32 %v2168_v36, 0.0 }
 0x2ca   :  { %v3033_v31 = vpop.f32.mrf.mxu0 }
 0x2cb   :  { %v2171_v7 = vadd.f32 %v3032_v22, %v4786_v62 }
 0x2cc   :  { %v3034_v58 = vpop.f32.mrf.mxu0 }
 0x2cd   :  { %v2211_v12 = vmax.f32 %v2171_v7, 0.0  ;;  %v3035_v14 = vadd.f32 %v3034_v58, %v3033_v31 }
 0x2ce   :  { %v3036_v35 = vpop.f32.mrf.mxu0 }
 0x2cf   :  { %v2228_v11 = vpack.c.bf16 %v2211_v12, %v2210_v27  ;;  %v2176_v42 = vadd.f32 %v3035_v14, %v4786_v62 }
 0x2d0   :  { %v3037_v39 = vpop.f32.mrf.mxu0 }
 0x2d1   :  { %v3038_v9 = vadd.f32 %v3037_v39, %v3036_v35  ;;  %3131 = vmatprep.mubr.bf16.mxu1 %v2228_v11  ;;  %v2212_v63 = vmax.f32 %v2176_v42, 0.0 }
 0x2d3   :  { %v2179_v40 = vadd.f32 %v3038_v9, %v4786_v62 }
 0x2d5   :  { %v2213_v19 = vmax.f32 %v2179_v40, 0.0 }
 0x2d7   :  { %v2229_v18 = vpack.c.bf16 %v2213_v19, %v2212_v63 }
 0x2d9   :  { %3132 = vmatmul.mubr.bf16.gmra.mxu1 %v2229_v18 }
 0x329   :  { %v3105_v24 = vpop.f32.mrf.mxu1 }
 0x32a   :  { %v2344_v29 = vadd.f32 %v3105_v24, %v4847_v30 }
 0x32b   :  { %v2335_v47 = vpop.f32.mrf.mxu1 }
 0x32c   :  { %v2336_v25 = vadd.f32 %v4847_v30, %v2335_v47  ;;  %v2464_v1 = vmax.f32 %v2344_v29, 0.0 }
 0x32d   :  { %v3106_v28 = vpop.f32.mrf.mxu1 }
 0x32e   :  { %v2347_v33 = vadd.f32 %v3106_v28, %v4847_v30  ;;  %v2462_v5 = vmax.f32 %v2336_v25, 0.0 }
 0x32f   :  { %v2338_v26 = vpop.f32.mrf.mxu1 }
 0x330   :  { %v2339_v62 = vadd.f32 %v4847_v30, %v2338_v26  ;;  %v2465_v34 = vmax.f32 %v2347_v33, 0.0 }
 0x332   :  { %v2463_v55 = vmax.f32 %v2339_v62, 0.0  ;;  %v2495_v41 = vpack.c.bf16 %v2465_v34, %v2464_v1 }
 0x334   :  { %v2494_v4 = vpack.c.bf16 %v2463_v55, %v2462_v5 }
 0x336   :  { %3151 = vmatprep.mubr.bf16.mxu1 %v2494_v4 }
 0x337   :  { %3152 = vmatmul.mubr.bf16.vlgmr.msra.gmra.mxu1 %v2495_v41 }
 0x339   :  { %v3109_v48 = vpop.f32.mrf.mxu1 }
 0x33a   :  { %v2360_v3 = vadd.f32 %v3109_v48, %v4847_v30 }
 0x33b   :  { %v2351_v43 = vpop.f32.mrf.mxu1 }
 0x33c   :  { %v2352_v56 = vadd.f32 %v4847_v30, %v2351_v43  ;;  %v2468_v46 = vmax.f32 %v2360_v3, 0.0 }
 0x33d   :  { %v3110_v6 = vpop.f32.mrf.mxu1 }
 0x33e   :  { %v2363_v45 = vadd.f32 %v3110_v6, %v4847_v30  ;;  %v2466_v32 = vmax.f32 %v2352_v56, 0.0 }
 0x33f   :  { %v2354_v37 = vpop.f32.mrf.mxu1 }
 0x340   :  { %v2355_v38 = vadd.f32 %v4847_v30, %v2354_v37  ;;  %v2469_v51 = vmax.f32 %v2363_v45, 0.0 }
 0x342   :  { %v2467_v16 = vmax.f32 %v2355_v38, 0.0  ;;  %v2497_v15 = vpack.c.bf16 %v2469_v51, %v2468_v46 }
 0x344   :  { %v2496_v44 = vpack.c.bf16 %v2467_v16, %v2466_v32 }
 0x346   :  { %3155 = vmatprep.mubr.bf16.mxu1 %v2496_v44 }
 0x347   :  { %3156 = vmatmul.mubr.bf16.gmra.mxu1 %v2497_v15 }
 0x349   :  { %v3113_v49 = vpop.f32.mrf.mxu1 }
 0x34a   :  { %v2376_v61 = vadd.f32 %v3113_v49, %v4847_v30 }
 0x34b   :  { %v2367_v57 = vpop.f32.mrf.mxu1 }
 0x34c   :  { %v2368_v50 = vadd.f32 %v4847_v30, %v2367_v57  ;;  %v2472_v60 = vmax.f32 %v2376_v61, 0.0 }
 0x34d   :  { %v3114_v52 = vpop.f32.mrf.mxu1 }
 0x34e   :  { %v2379_v53 = vadd.f32 %v3114_v52, %v4847_v30  ;;  %v2470_v10 = vmax.f32 %v2368_v50, 0.0 }
 0x34f   :  { %v2370_v8 = vpop.f32.mrf.mxu1 }
 0x350   :  { %v2371_v59 = vadd.f32 %v4847_v30, %v2370_v8  ;;  %v2473_v17 = vmax.f32 %v2379_v53, 0.0 }
 0x352   :  { %v2471_v13 = vmax.f32 %v2371_v59, 0.0  ;;  %v2499_v20 = vpack.c.bf16 %v2473_v17, %v2472_v60 }
 0x354   :  { %v2498_v0 = vpack.c.bf16 %v2471_v13, %v2470_v10 }
 0x356   :  { %3159 = vmatprep.mubr.bf16.mxu1 %v2498_v0 }
 0x357   :  { %3160 = vmatmul.mubr.bf16.gmra.mxu1 %v2499_v20 }
 0x359   :  { %v3117_v21 = vpop.f32.mrf.mxu1 }
 0x35a   :  { %v2392_v22 = vadd.f32 %v3117_v21, %v4847_v30 }
 0x35b   :  { %v2383_v23 = vpop.f32.mrf.mxu1 }
 0x35c   :  { %v2384_v2 = vadd.f32 %v4847_v30, %v2383_v23  ;;  %v2476_v14 = vmax.f32 %v2392_v22, 0.0 }
 0x35d   :  { %v3118_v54 = vpop.f32.mrf.mxu1 }
 0x35e   :  { %v2395_v36 = vadd.f32 %v3118_v54, %v4847_v30  ;;  %v2474_v27 = vmax.f32 %v2384_v2, 0.0 }
 0x35f   :  { %v2386_v31 = vpop.f32.mrf.mxu1 }
 0x360   :  { %v2387_v7 = vadd.f32 %v4847_v30, %v2386_v31  ;;  %v2477_v58 = vmax.f32 %v2395_v36, 0.0 }
 0x362   :  { %v2475_v12 = vmax.f32 %v2387_v7, 0.0  ;;  %v2501_v11 = vpack.c.bf16 %v2477_v58, %v2476_v14  ;;  %v4884_v7 = vld [vmem:[%s5022_s8] ss:$0 sm:$0xff] }
 0x364   :  { %v2500_v35 = vpack.c.bf16 %v2475_v12, %v2474_v27 }
 0x366   :  { %3163 = vmatprep.mubr.bf16.mxu1 %v2500_v35 }
 0x367   :  { %3164 = vmatmul.mubr.bf16.gmra.mxu1 %v2501_v11 }
 0x369   :  { %v3121_v39 = vpop.f32.mrf.mxu1 }
 0x36a   :  { %v2408_v19 = vadd.f32 %v3121_v39, %v4847_v30 }
 0x36b   :  { %v2399_v42 = vpop.f32.mrf.mxu1 }
 0x36c   :  { %v2400_v40 = vadd.f32 %v4847_v30, %v2399_v42  ;;  %v2480_v33 = vmax.f32 %v2408_v19, 0.0 }
 0x36d   :  { %v3122_v9 = vpop.f32.mrf.mxu1 }
 0x36e   :  { %v2411_v63 = vadd.f32 %v3122_v9, %v4847_v30  ;;  %v2478_v28 = vmax.f32 %v2400_v40, 0.0 }
 0x36f   :  { %v2402_v18 = vpop.f32.mrf.mxu1 }
 0x370   :  { %v2403_v24 = vadd.f32 %v4847_v30, %v2402_v18  ;;  %v2481_v47 = vmax.f32 %v2411_v63, 0.0 }
 0x372   :  { %v2479_v25 = vmax.f32 %v2403_v24, 0.0  ;;  %v2503_v26 = vpack.c.bf16 %v2481_v47, %v2480_v33 }
 0x374   :  { %v2502_v29 = vpack.c.bf16 %v2479_v25, %v2478_v28 }
 0x376   :  { %3167 = vmatprep.mubr.bf16.mxu1 %v2502_v29 }
 0x377   :  { %3168 = vmatmul.mubr.bf16.gmra.mxu1 %v2503_v26 }
 0x379   :  { %v3125_v62 = vpop.f32.mrf.mxu1 }
 0x37a   :  { %v2424_v4 = vadd.f32 %v3125_v62, %v4847_v30 }
 0x37b   :  { %v2415_v34 = vpop.f32.mrf.mxu1 }
 0x37c   :  { %v2416_v55 = vadd.f32 %v4847_v30, %v2415_v34  ;;  %v2484_v45 = vmax.f32 %v2424_v4, 0.0 }
 0x37d   :  { %v3126_v5 = vpop.f32.mrf.mxu1 }
 0x37e   :  { %v2427_v1 = vadd.f32 %v3126_v5, %v4847_v30  ;;  %v2482_v6 = vmax.f32 %v2416_v55, 0.0 }
 0x37f   :  { %v2418_v41 = vpop.f32.mrf.mxu1 }
 0x380   :  { %v2419_v48 = vadd.f32 %v4847_v30, %v2418_v41  ;;  %v2485_v43 = vmax.f32 %v2427_v1, 0.0 }
 0x382   :  { %v2483_v56 = vmax.f32 %v2419_v48, 0.0  ;;  %v2505_v37 = vpack.c.bf16 %v2485_v43, %v2484_v45 }
 0x384   :  { %v2504_v3 = vpack.c.bf16 %v2483_v56, %v2482_v6 }
 0x386   :  { %3171 = vmatprep.mubr.bf16.mxu1 %v2504_v3 }
 0x387   :  { %3172 = vmatmul.mubr.bf16.gmra.mxu1 %v2505_v37 }
 0x389   :  { %v3129_v38 = vpop.f32.mrf.mxu1 }
 0x38a   :  { %v2440_v44 = vadd.f32 %v3129_v38, %v4847_v30 }
 0x38b   :  { %v2431_v51 = vpop.f32.mrf.mxu1 }
 0x38c   :  { %v2432_v16 = vadd.f32 %v4847_v30, %v2431_v51  ;;  %v2488_v53 = vmax.f32 %v2440_v44, 0.0 }
 0x38d   :  { %v3130_v32 = vpop.f32.mrf.mxu1 }
 0x38e   :  { %v2443_v46 = vadd.f32 %v3130_v32, %v4847_v30  ;;  %v2486_v52 = vmax.f32 %v2432_v16, 0.0 }
 0x38f   :  { %v2434_v15 = vpop.f32.mrf.mxu1 }
 0x390   :  { %v2435_v49 = vadd.f32 %v4847_v30, %v2434_v15  ;;  %v2489_v57 = vmax.f32 %v2443_v46, 0.0 }
 0x392   :  { %v2487_v50 = vmax.f32 %v2435_v49, 0.0  ;;  %v2507_v8 = vpack.c.bf16 %v2489_v57, %v2488_v53 }
 0x394   :  { %v2506_v61 = vpack.c.bf16 %v2487_v50, %v2486_v52 }
 0x396   :  { %3175 = vmatprep.mubr.bf16.mxu1 %v2506_v61 }
 0x397   :  { %3176 = vmatmul.mubr.bf16.gmra.mxu1 %v2507_v8 }
 0x399   :  { %v3133_v59 = vpop.f32.mrf.mxu1 }
 0x39a   :  { %v2456_v0 = vadd.f32 %v3133_v59, %v4847_v30 }
 0x39b   :  { %v2447_v17 = vpop.f32.mrf.mxu1 }
 0x39c   :  { %v2448_v13 = vadd.f32 %v4847_v30, %v2447_v17  ;;  %v2492_v36 = vmax.f32 %v2456_v0, 0.0 }
 0x39d   :  { %v3134_v10 = vpop.f32.mrf.mxu1 }
 0x39e   :  { %v2459_v60 = vadd.f32 %v3134_v10, %v4847_v30  ;;  %v2490_v54 = vmax.f32 %v2448_v13, 0.0 }
 0x39f   :  { %v2450_v20 = vpop.f32.mrf.mxu1 }
 0x3a0   :  { %v2451_v21 = vadd.f32 %v4847_v30, %v2450_v20  ;;  %v2493_v23 = vmax.f32 %v2459_v60, 0.0 }
 0x3a2   :  { %v2491_v2 = vmax.f32 %v2451_v21, 0.0  ;;  %v2509_v31 = vpack.c.bf16 %v2493_v23, %v2492_v36 }
 0x3a4   :  { %v2508_v22 = vpack.c.bf16 %v2491_v2, %v2490_v54 }
 0x3a6   :  { %3179 = vmatprep.mubr.bf16.mxu1 %v2508_v22 }
 0x3a7   :  { %3180 = vmatmul.mubr.bf16.gmra.mxu1 %v2509_v31 }
 0x3f7   :  { %v3153_v58 = vpop.f32.mrf.mxu1 }
 0x3f8   :  { %v2624_v27 = vadd.f32 %v3153_v58, %v4884_v7 }
 0x3f9   :  { %v2615_v12 = vpop.f32.mrf.mxu1 }
 0x3fa   :  { %2744 = vst [vmem:[%s5023_s9 + $0x10] sm:$0xff] %v2624_v27  ;;  %v2616_v30 = vadd.f32 %v4884_v7, %v2615_v12 }
 0x3fb   :  { %v3154_v14 = vpop.f32.mrf.mxu1 }
 0x3fc   :  { %2742 = vst [vmem:[%s5023_s9] sm:$0xff] %v2616_v30  ;;  %v2627_v35 = vadd.f32 %v3154_v14, %v4884_v7 }
 0x3fd   :  { %v2618_v11 = vpop.f32.mrf.mxu1 }
 0x3fe   :  { %2745 = vst [vmem:[%s5023_s9 + $0x18] sm:$0xff] %v2627_v35  ;;  %v2619_v39 = vadd.f32 %v4884_v7, %v2618_v11 }
 0x400   :  { %2743 = vst [vmem:[%s5023_s9 + $0x8] sm:$0xff] %v2619_v39 }
 0x407   :  { %v3157_v42 = vpop.f32.mrf.mxu1 }
 0x408   :  { %v2640_v9 = vadd.f32 %v3157_v42, %v4884_v7 }
 0x409   :  { %v2631_v40 = vpop.f32.mrf.mxu1 }
 0x40a   :  { %2748 = vst [vmem:[%s5023_s9 + $0x30] sm:$0xff] %v2640_v9  ;;  %v2632_v63 = vadd.f32 %v4884_v7, %v2631_v40 }
 0x40b   :  { %v3158_v19 = vpop.f32.mrf.mxu1 }
 0x40c   :  { %2746 = vst [vmem:[%s5023_s9 + $0x20] sm:$0xff] %v2632_v63  ;;  %v2643_v18 = vadd.f32 %v3158_v19, %v4884_v7 }
 0x40d   :  { %v2634_v24 = vpop.f32.mrf.mxu1 }
 0x40e   :  { %2749 = vst [vmem:[%s5023_s9 + $0x38] sm:$0xff] %v2643_v18  ;;  %v2635_v47 = vadd.f32 %v4884_v7, %v2634_v24 }
 0x410   :  { %2747 = vst [vmem:[%s5023_s9 + $0x28] sm:$0xff] %v2635_v47 }
 0x417   :  { %v3161_v28 = vpop.f32.mrf.mxu1 }
 0x418   :  { %v2656_v25 = vadd.f32 %v3161_v28, %v4884_v7 }
 0x419   :  { %v2647_v33 = vpop.f32.mrf.mxu1 }
 0x41a   :  { %2752 = vst [vmem:[%s5023_s9 + $0x50] sm:$0xff] %v2656_v25  ;;  %v2648_v29 = vadd.f32 %v4884_v7, %v2647_v33 }
 0x41b   :  { %v3162_v26 = vpop.f32.mrf.mxu1 }
 0x41c   :  { %2750 = vst [vmem:[%s5023_s9 + $0x40] sm:$0xff] %v2648_v29  ;;  %v2659_v62 = vadd.f32 %v3162_v26, %v4884_v7 }
 0x41d   :  { %v2650_v34 = vpop.f32.mrf.mxu1 }
 0x41e   :  { %2753 = vst [vmem:[%s5023_s9 + $0x58] sm:$0xff] %v2659_v62  ;;  %v2651_v5 = vadd.f32 %v4884_v7, %v2650_v34 }
 0x420   :  { %2751 = vst [vmem:[%s5023_s9 + $0x48] sm:$0xff] %v2651_v5 }
 0x427   :  { %v3165_v55 = vpop.f32.mrf.mxu1 }
 0x428   :  { %v2672_v1 = vadd.f32 %v3165_v55, %v4884_v7 }
 0x429   :  { %v2663_v4 = vpop.f32.mrf.mxu1 }
 0x42a   :  { %2756 = vst [vmem:[%s5023_s9 + $0x70] sm:$0xff] %v2672_v1  ;;  %v2664_v41 = vadd.f32 %v4884_v7, %v2663_v4 }
 0x42b   :  { %v3166_v48 = vpop.f32.mrf.mxu1 }
 0x42c   :  { %2754 = vst [vmem:[%s5023_s9 + $0x60] sm:$0xff] %v2664_v41  ;;  %v2675_v43 = vadd.f32 %v3166_v48, %v4884_v7 }
 0x42d   :  { %v2666_v6 = vpop.f32.mrf.mxu1 }
 0x42e   :  { %2757 = vst [vmem:[%s5023_s9 + $0x78] sm:$0xff] %v2675_v43  ;;  %v2667_v56 = vadd.f32 %v4884_v7, %v2666_v6 }
 0x430   :  { %2755 = vst [vmem:[%s5023_s9 + $0x68] sm:$0xff] %v2667_v56 }
 0x437   :  { %v3169_v45 = vpop.f32.mrf.mxu1 }
 0x438   :  { %v2688_v3 = vadd.f32 %v3169_v45, %v4884_v7 }
 0x439   :  { %v2679_v37 = vpop.f32.mrf.mxu1 }
 0x43a   :  { %2760 = vst [vmem:[%s5023_s9 + $0x90] sm:$0xff] %v2688_v3  ;;  %v2680_v38 = vadd.f32 %v4884_v7, %v2679_v37 }
 0x43b   :  { %v3170_v51 = vpop.f32.mrf.mxu1 }
 0x43c   :  { %2758 = vst [vmem:[%s5023_s9 + $0x80] sm:$0xff] %v2680_v38  ;;  %v2691_v32 = vadd.f32 %v3170_v51, %v4884_v7 }
 0x43d   :  { %v2682_v16 = vpop.f32.mrf.mxu1 }
 0x43e   :  { %2761 = vst [vmem:[%s5023_s9 + $0x98] sm:$0xff] %v2691_v32  ;;  %v2683_v46 = vadd.f32 %v4884_v7, %v2682_v16 }
 0x440   :  { %2759 = vst [vmem:[%s5023_s9 + $0x88] sm:$0xff] %v2683_v46 }
 0x447   :  { %v3173_v44 = vpop.f32.mrf.mxu1 }
 0x448   :  { %v2704_v15 = vadd.f32 %v3173_v44, %v4884_v7 }
 0x449   :  { %v2695_v49 = vpop.f32.mrf.mxu1 }
 0x44a   :  { %2764 = vst [vmem:[%s5023_s9 + $0xb0] sm:$0xff] %v2704_v15  ;;  %v2696_v57 = vadd.f32 %v4884_v7, %v2695_v49 }
 0x44b   :  { %v3174_v52 = vpop.f32.mrf.mxu1 }
 0x44c   :  { %2762 = vst [vmem:[%s5023_s9 + $0xa0] sm:$0xff] %v2696_v57  ;;  %v2707_v50 = vadd.f32 %v3174_v52, %v4884_v7 }
 0x44d   :  { %v2698_v53 = vpop.f32.mrf.mxu1 }
 0x44e   :  { %2765 = vst [vmem:[%s5023_s9 + $0xb8] sm:$0xff] %v2707_v50  ;;  %v2699_v61 = vadd.f32 %v4884_v7, %v2698_v53 }
 0x450   :  { %2763 = vst [vmem:[%s5023_s9 + $0xa8] sm:$0xff] %v2699_v61 }
 0x457   :  { %v3177_v8 = vpop.f32.mrf.mxu1 }
 0x458   :  { %v2720_v59 = vadd.f32 %v3177_v8, %v4884_v7 }
 0x459   :  { %v2711_v17 = vpop.f32.mrf.mxu1 }
 0x45a   :  { %2768 = vst [vmem:[%s5023_s9 + $0xd0] sm:$0xff] %v2720_v59  ;;  %v2712_v10 = vadd.f32 %v4884_v7, %v2711_v17 }
 0x45b   :  { %v3178_v13 = vpop.f32.mrf.mxu1 }
 0x45c   :  { %2766 = vst [vmem:[%s5023_s9 + $0xc0] sm:$0xff] %v2712_v10  ;;  %v2723_v60 = vadd.f32 %v3178_v13, %v4884_v7 }
 0x45d   :  { %v2714_v0 = vpop.f32.mrf.mxu1 }
 0x45e   :  { %2769 = vst [vmem:[%s5023_s9 + $0xd8] sm:$0xff] %v2723_v60  ;;  %v2715_v20 = vadd.f32 %v4884_v7, %v2714_v0 }
 0x460   :  { %2767 = vst [vmem:[%s5023_s9 + $0xc8] sm:$0xff] %v2715_v20 }
 0x467   :  { %v3181_v21 = vpop.f32.mrf.mxu1 }
 0x468   :  { %v2736_v23 = vadd.f32 %v3181_v21, %v4884_v7 }
 0x469   :  { %v2727_v54 = vpop.f32.mrf.mxu1 }
 0x46a   :  { %2772 = vst [vmem:[%s5023_s9 + $0xf0] sm:$0xff] %v2736_v23  ;;  %v2728_v2 = vadd.f32 %v4884_v7, %v2727_v54 }
 0x46b   :  { %v3182_v36 = vpop.f32.mrf.mxu1 }
 0x46c   :  { %2770 = vst [vmem:[%s5023_s9 + $0xe0] sm:$0xff] %v2728_v2  ;;  %v2739_v22 = vadd.f32 %v3182_v36, %v4884_v7 }
 0x46d   :  { %v2730_v31 = vpop.f32.mrf.mxu1 }
 0x46e   :  { %2773 = vst [vmem:[%s5023_s9 + $0xf8] sm:$0xff] %v2739_v22  ;;  %v2731_v58 = vadd.f32 %v4884_v7, %v2730_v31 }
 0x470   :  { %2771 = vst [vmem:[%s5023_s9 + $0xe8] sm:$0xff] %v2731_v58 }

</bundles_post_ra>
